<compile_context>
chip_gen: v7x
topology: tpu7x:2x2x1
jax: 0.10.0
libtpu: 0.0.40
codegen_flags: <defaults>
</compile_context>

<pallas_src>
import jax
import jax.numpy as jnp
from jax.experimental import pallas as pl
from jax.experimental.pallas import tpu as pltpu

H, W = 64, 64            # spatial size forced by x.reshape(-1, 64, 64, 1)
KH, KW = 3, 3
C1, C2 = 64, 32
OH, OW = H - KH + 1, W - KW + 1   # 62, 62 (conv-1 output)
HW = H * W                        # 4096 (lane-dense spatial dim)
NTAP = KH * KW                    # 9 taps per conv
KCOLS = NTAP * NTAP               # 81 fused im2col columns


# ----------------------------------------------------------------------------- kernel
def net_kernel(q_ref, wt_ref, bias_ref, out_ref):
    """One grid step processes `bb` images.

    q_ref   : (bb, 81, 4096) bf16   fused im2col patches (spatial on lanes)
    wt_ref  : (32, 81)       bf16   fused weights W12^T
    bias_ref: (32, 4096)     f32    b2 + position-dependent b1-through-w2 term
    out_ref : (bb, 32, 4096) f32    NCHW output (H*W merged -> fully lane-dense stores)
    """
    bb = out_ref.shape[0]
    wt = wt_ref[...]                      # loaded once per step
    bias = bias_ref[...]
    for b in range(bb):                   # static unroll, bb <= 4
        z = jnp.dot(wt, q_ref[b], preferred_element_type=jnp.float32)  # (32, 4096) MXU
        out_ref[b] = z + bias             # single lane-dense store per image


# ----------------------------------------------------------------------------- wrapper
def _validity_masks(dtype):
    """Per-tap validity window of the inverse conv: tap (kh2,kw2) contributes to output
    (h,w) iff 0 <= h-kh2 < 62 and 0 <= w-kw2 < 62."""
    hh = jnp.arange(H)[:, None]
    ww = jnp.arange(W)[None, :]
    masks = []
    for kh2 in range(KH):
        for kw2 in range(KW):
            m = (hh >= kh2) & (hh < kh2 + OH) & (ww >= kw2) & (ww < kw2 + OW)
            masks.append(m.astype(dtype))
    return masks                          # 9 x (H, W), t = kh2*3 + kw2


def _build_patches(x_img):
    """(N, H, W) f32 -> (N, 81, H*W) bf16 fused im2col.

    Column (t*9 + k) at pixel (h, w) is  mask_t(h,w) * x[h + kh - kh2, w + kw - kw2]
    with t=(kh2,kw2), k=(kh,kw).  Pure data movement; built by XLA.
    """
    n = x_img.shape[0]
    xp = jnp.pad(x_img, ((0, 0), (KH - 1, KH - 1), (KW - 1, KW - 1)))   # (N, 68, 68)
    masks = _validity_masks(x_img.dtype)
    cols = []
    t = 0
    for kh2 in range(KH):
        for kw2 in range(KW):
            vm = masks[t][None]                                         # (1, H, W)
            for kh in range(KH):
                for kw in range(KW):
                    dh, dw = kh - kh2, kw - kw2                          # in [-2, 2]
                    xs = xp[:, 2 + dh:2 + dh + H, 2 + dw:2 + dw + W]     # (N, H, W)
                    cols.append(xs * vm)
            t += 1
    q = jnp.stack(cols, axis=1)                                          # (N, 81, H, W)
    return q.reshape(n, KCOLS, HW).astype(jnp.bfloat16)


def _fuse_params(w1, b1, w2, b2):
    """Precompute W12^T (32, 81) and the position-dependent bias map (32, 4096)."""
    w1f = w1.reshape(NTAP, C1).astype(jnp.float32)            # [k, c1]
    w2f = w2.reshape(NTAP, C1, C2).astype(jnp.float32)        # [t, c1, c2]
    w12 = jnp.einsum('kc,tcd->tkd', w1f, w2f,
                     precision=jax.lax.Precision.HIGHEST)     # (9, 9, 32)
    wt = w12.reshape(KCOLS, C2).T.astype(jnp.bfloat16)        # (32, 81)

    b1v = b1.reshape(C1).astype(jnp.float32)
    bcontrib = jnp.einsum('c,tcd->td', b1v, w2f)              # (9, 32)  b1 through w2[t]
    masks = _validity_masks(jnp.float32)
    bias_hw = jnp.broadcast_to(b2.reshape(1, 1, C2).astype(jnp.float32), (H, W, C2))
    for t in range(NTAP):
        bias_hw = bias_hw + masks[t][:, :, None] * bcontrib[t][None, None, :]
    bias_t = bias_hw.reshape(HW, C2).T                        # (32, 4096), col = h*64+w
    return wt, bias_t


@jax.jit
def net_forward(x, w1, b1, w2, b2):
    """Dense-equivalent of Net.forward. Returns NCHW (N, 32, 64, 64)."""
    x_img = jnp.reshape(x, (-1, H, W)).astype(jnp.float32)
    n = x_img.shape[0]

    # Batch block: amortize the ~0.35us per-step overhead, but keep >= 2 grid steps
    # whenever n >= 2 so the "parallel" grid axis can use both TensorCores (v7x / megacore).
    bb = 1 if n < 4 else (2 if n < 8 else 4)
    npad = ((n + bb - 1) // bb) * bb

    q = _build_patches(x_img)                                 # (n, 81, 4096) bf16
    if npad != n:
        q = jnp.pad(q, ((0, npad - n), (0, 0), (0, 0)))
    wt, bias_t = _fuse_params(w1, b1, w2, b2)

    out_flat = pl.pallas_call(
        net_kernel,
        out_shape=jax.ShapeDtypeStruct((npad, C2, HW), jnp.float32),
        grid_spec=pltpu.PrefetchScalarGridSpec(
            num_scalar_prefetch=0,
            grid=(npad // bb,),
            in_specs=[
                pl.BlockSpec((bb, KCOLS, HW), lambda i: (i, 0, 0)),
                pl.BlockSpec((C2, KCOLS), lambda i: (0, 0)),   # weights: fetched once
                pl.BlockSpec((C2, HW), lambda i: (0, 0)),      # bias map: fetched once
            ],
            out_specs=pl.BlockSpec((bb, C2, HW), lambda i: (i, 0, 0)),
        ),
        compiler_params=pltpu.CompilerParams(
            dimension_semantics=("parallel",),
            vmem_limit_bytes=32 * 1024 * 1024,
        ),
    )(q, wt, bias_t)

    # Already NCHW with H*W merged -> free metadata reshape, no XLA transpose round trip.
    return out_flat[:n].reshape(n, C2, H, W)


def reference_forward(x, w1, b1, w2, b2):
    """Pure-JAX reference of the same dense-equivalent math (two explicit stages)."""
    x_nhwc = jnp.reshape(x, (-1, H, W, 1)).astype(jnp.float32)
    n = x_nhwc.shape[0]
    y = jnp.zeros((n, OH, OW, C1), jnp.float32) + b1.reshape(1, 1, 1, C1)
    for kh in range(KH):
        for kw in range(KW):
            y = y + x_nhwc[:, kh:kh + OH, kw:kw + OW, :] * w1[kh, kw].reshape(1, 1, 1, C1)
    z = jnp.zeros((n, H, W, C2), jnp.float32) + b2.reshape(1, 1, 1, C2)
    for kh in range(KH):
        for kw in range(KW):
            z = z.at[:, kh:kh + OH, kw:kw + OW, :].add(
                jnp.einsum('nhwc,cd->nhwd', y, w2[kh, kw],
                           precision=jax.lax.Precision.HIGHEST))
    return jnp.transpose(z, (0, 3, 1, 2))


if __name__ == "__main__":
    key = jax.random.PRNGKey(0)
    kx, k1, k2, k3, k4 = jax.random.split(key, 5)

    # Deterministic parameter init (shapes implied by Net.__init__).
    w1 = jax.random.normal(k1, (KH, KW, C1), jnp.float32) * 0.2       # Conv 1->64, 3x3 (Cin squeezed)
    b1 = jax.random.normal(k2, (1, C1), jnp.float32) * 0.05
    w2 = jax.random.normal(k3, (KH, KW, C1, C2), jnp.float32) * 0.05  # InverseConv 64->32, 3x3
    b2 = jax.random.normal(k4, (1, C2), jnp.float32) * 0.05

    # Input: batch of 2 images; forward reshapes to (-1, 64, 64, 1).
    x = jax.random.normal(kx, (2, H, W), jnp.float32)

    out = net_forward(x, w1, b1, w2, b2)
    out = jax.block_until_ready(out)
    assert out.shape == (2, C2, H, W), out.shape

    ref = reference_forward(x, w1, b1, w2, b2)
    max_err = float(jnp.max(jnp.abs(out - ref)))
    assert jnp.allclose(out, ref, rtol=2e-2, atol=2e-2), max_err

    print("KERNEL_OK")
</pallas_src>

<mosaic_0001>
module attributes {stable_mosaic.version = 11 : i64} {
  func.func @net_kernel(%arg0: i32, %arg1: memref<1x81x4096xbf16, #tpu.memory_space<vmem>>, %arg2: memref<32x81xbf16, #tpu.memory_space<vmem>>, %arg3: memref<32x4096xf32, #tpu.memory_space<vmem>>, %arg4: memref<1x32x4096xf32, #tpu.memory_space<vmem>>) attributes {dimension_semantics = [#tpu.dimension_semantics<parallel>], iteration_bounds = array<i64: 2>, scalar_prefetch = 0 : i64, scratch_operands = 0 : i64, tpu.core_type = #tpu.core_type<tc>, window_params = [{transform_indices = @transform_0, window_bounds = array<i64: 1, 81, 4096>}, {pipeline_mode = #tpu.pipeline_mode<synchronous>, transform_indices = @transform_1, window_bounds = array<i64: 32, 81>}, {pipeline_mode = #tpu.pipeline_mode<synchronous>, transform_indices = @transform_2, window_bounds = array<i64: 32, 4096>}, {transform_indices = @transform_3, window_bounds = array<i64: 1, 32, 4096>}]} {
    %c0 = arith.constant 0 : index
    %c0_0 = arith.constant 0 : index
    %0 = vector.load %arg2[%c0, %c0_0] : memref<32x81xbf16, #tpu.memory_space<vmem>>, vector<32x81xbf16>
    %c0_1 = arith.constant 0 : index
    %c0_2 = arith.constant 0 : index
    %1 = vector.load %arg3[%c0_1, %c0_2] : memref<32x4096xf32, #tpu.memory_space<vmem>>, vector<32x4096xf32>
    %c0_3 = arith.constant 0 : index
    %c0_4 = arith.constant 0 : index
    %c0_5 = arith.constant 0 : index
    %2 = vector.load %arg1[%c0_3, %c0_4, %c0_5] : memref<1x81x4096xbf16, #tpu.memory_space<vmem>>, vector<1x81x4096xbf16>
    %3 = vector.shape_cast %2 : vector<1x81x4096xbf16> to vector<81x4096xbf16>
    %cst = arith.constant dense<0.000000e+00> : vector<32x4096xf32>
    %4 = tpu.matmul %0, %3, %cst {dimension_numbers = #tpu.dot_dimension_numbers<[1], [0], [0], [1], [0, 0, 1, 1], [], []>} : vector<32x81xbf16>, vector<81x4096xbf16>, vector<32x4096xf32> -> vector<32x4096xf32>
    %5 = arith.addf %4, %1 : vector<32x4096xf32>
    %c0_6 = arith.constant 0 : index
    %c0_7 = arith.constant 0 : index
    %c0_8 = arith.constant 0 : index
    %6 = vector.load %arg4[%c0_6, %c0_7, %c0_8] : memref<1x32x4096xf32, #tpu.memory_space<vmem>>, vector<1x32x4096xf32>
    %7 = vector.shape_cast %6 : vector<1x32x4096xf32> to vector<32x4096xf32>
    %8 = vector.shape_cast %5 : vector<32x4096xf32> to vector<1x32x4096xf32>
    tpu.vector_store %arg4[%c0_6, %c0_7, %c0_8], %8 {strides = array<i32>} : memref<1x32x4096xf32, #tpu.memory_space<vmem>>, vector<1x32x4096xf32>,
    return
  }
  func.func @transform_0(%arg0: i32) -> (i32, i32, i32) {
    %c0_i32 = arith.constant 0 : i32
    %c0_i32_0 = arith.constant 0 : i32
    %c0_i32_1 = arith.constant 0 : i32
    return %arg0, %c0_i32, %c0_i32_0 : i32, i32, i32
  }
  func.func @transform_1(%arg0: i32) -> (i32, i32) {
    %c0_i32 = arith.constant 0 : i32
    %c0_i32_0 = arith.constant 0 : i32
    %c0_i32_1 = arith.constant 0 : i32
    return %c0_i32, %c0_i32_0 : i32, i32
  }
  func.func @transform_2(%arg0: i32) -> (i32, i32) {
    %c0_i32 = arith.constant 0 : i32
    %c0_i32_0 = arith.constant 0 : i32
    %c0_i32_1 = arith.constant 0 : i32
    return %c0_i32, %c0_i32_0 : i32, i32
  }
  func.func @transform_3(%arg0: i32) -> (i32, i32, i32) {
    %c0_i32 = arith.constant 0 : i32
    %c0_i32_0 = arith.constant 0 : i32
    %c0_i32_1 = arith.constant 0 : i32
    return %arg0, %c0_i32, %c0_i32_0 : i32, i32, i32
  }
}

</mosaic_0001>

<bundles_post_ra>
// kernel: net_forward.1
= control target key start
LH: loop header
LB: loop body
LE: loop exit
PB: predicated region body
PF: predicated region fallthrough
CT: control target
= control target key end

     0   :  { %s2819_s12 = smov 0   ;;  %s3732_s0 = inlined_call_operand.vmem [shape: bf16[2,81,4096], index: 0, kind: input, shape index: {}]   ;;  %s3733_s1 = inlined_call_operand.vmem [shape: bf16[32,81], index: 1, kind: input, shape index: {}]   ;;  %s3734_s2 = inlined_call_operand.vmem [shape: f32[32,4096], index: 2, kind: input, shape index: {}]   ;;  %s3735_s3 = inlined_call_operand.vmem [shape: f32[2,32,4096], index: 3, kind: output, shape index: {}]  }
   0x1 LB: > { %s2507_s13 = sadd.s32 4294967295, %s2796_s12   ;;  %p2511_p0 = scmp.ge.s32.totalorder %s2796_s12, 1  ;;  %s2796_s12 = sphi %s2819_s12, %s13_s12  }
   0x2   : > { %p137_p1 = scmp.lt.s32.totalorder %s2796_s12, 3 }
   0x4   : > { %p138_p2 = pnand %p2511_p0, %p137_p1 }
   0x5   : > { %p161_p3 = scmp.lt.s32.totalorder (!%p138_p2), %s2507_s13, 1  ;;  %v2798_v0 = vmov (!%p138_p2), 0   ;;  %vm1377_vm0 = vcmask (!%p138_p2), 1040384   ;;  %v2875_v60 = vld [vmem:[%s3733_s1] sm:$0xff] (!%p138_p2)   ;;  %vm1370_vm1 = vcmask (!%p138_p2), 662528  }
   0x6   : > { %141 = sbr.rel (%p138_p2) target bundleno = 439 (0x1b7), region = 32  ;;  %1508 = vmatprep.mubr.bf16.mxu0 (!%p138_p2), %v2798_v0  ;;  %1561 = vmatprep.mubr.bf16.mxu1 (!%p138_p2), %v2798_v0  ;;  %v2860_v42 = vsel (!%p138_p2), %vm1377_vm0, 65535, %v2798_v0 }
   0xd   : > { %s3737_s13 = smov (!%p161_p3, %s2507_s13), 1 }
   0xe   : > { %s2744_s14 = smul.u32 1408, %s3737_s13  ;;  %s2743_s26 = sshll.u32 %s3737_s13, 10 }
   0xf   : > { %s3224_s8 = scalar_lea.vmem %s3735_s3, %s2743_s26 }
  0x10   : > { %s2835_s17 = scalar_lea.vmem %s3732_s0, %s2744_s14 }
  0x11   : > { %v304_v1 = vld [vmem:[%s2835_s17] sm:$0xff]  ;;  %v305_v3 = vld [vmem:[%s2835_s17 + $0x8] sm:$0xff]  ;;  %v306_v50 = vld [vmem:[%s2835_s17 + $0x10] sm:$0xff] }
  0x12   : > { %v320_v2 = vld [vmem:[%s2835_s17 + $0x80] sm:$0xff]  ;;  %v321_v5 = vld [vmem:[%s2835_s17 + $0x88] sm:$0xff]  ;;  %v322_v51 = vld [vmem:[%s2835_s17 + $0x90] sm:$0xff] }
  0x13   : > { %v2518_v4 = vcombine.high %v304_v1, %v320_v2  ;;  %v2517_v6 = vcombine.low %v304_v1, %v320_v2  ;;  %v336_v7 = vld [vmem:[%s2835_s17 + $0x100] sm:$0xff]  ;;  %v2520_v9 = vcombine.high %v305_v3, %v321_v5  ;;  %v2519_v10 = vcombine.low %v305_v3, %v321_v5  ;;  %v337_v12 = vld [vmem:[%s2835_s17 + $0x108] sm:$0xff]  ;;  %v307_v52 = vld [vmem:[%s2835_s17 + $0x18] sm:$0xff] }
  0x14   : > { %v352_v8 = vld [vmem:[%s2835_s17 + $0x180] sm:$0xff]  ;;  %v353_v13 = vld [vmem:[%s2835_s17 + $0x188] sm:$0xff]  ;;  %v323_v53 = vld [vmem:[%s2835_s17 + $0x98] sm:$0xff]  ;;  %v2522_v56 = vcombine.high %v306_v50, %v322_v51  ;;  %v2521_v63 = vcombine.low %v306_v50, %v322_v51 }
  0x15   : > { %v2550_v11 = vcombine.high %v336_v7, %v352_v8  ;;  %v368_v14 = vld [vmem:[%s2835_s17 + $0x200] sm:$0xff]  ;;  %1476 = vmatprep.subr.bf16.mxu0 %v2518_v4  ;;  %v2552_v15 = vcombine.high %v337_v12, %v353_v13  ;;  %v369_v17 = vld [vmem:[%s2835_s17 + $0x208] sm:$0xff]  ;;  %1529 = vmatprep.subr.bf16.mxu1 %v2520_v9  ;;  %v2549_v19 = vcombine.low %v336_v7, %v352_v8  ;;  %v338_v58 = vld [vmem:[%s2835_s17 + $0x110] sm:$0xff] }
  0x16   : > { %v384_v16 = vld [vmem:[%s2835_s17 + $0x280] sm:$0xff]  ;;  %v385_v18 = vld [vmem:[%s2835_s17 + $0x288] sm:$0xff]  ;;  %1477 = vmatpush1.bf16.msra.mxu0 %v2517_v6  ;;  %1530 = vmatpush1.bf16.msra.mxu1 %v2519_v10  ;;  %v2551_v20 = vcombine.low %v337_v12, %v353_v13  ;;  %v2524_v57 = vcombine.high %v307_v52, %v323_v53  ;;  %v354_v59 = vld [vmem:[%s2835_s17 + $0x190] sm:$0xff]  ;;  %v2523_v1 = vcombine.low %v307_v52, %v323_v53 }
  0x17   : > { %1478 = vmatprep.subr.bf16.mxu0 %v2550_v11  ;;  %v2582_v21 = vcombine.high %v368_v14, %v384_v16  ;;  %1531 = vmatprep.subr.bf16.mxu1 %v2552_v15  ;;  %v2584_v22 = vcombine.high %v369_v17, %v385_v18  ;;  %v400_v23 = vld [vmem:[%s2835_s17 + $0x300] sm:$0xff]  ;;  %v401_v25 = vld [vmem:[%s2835_s17 + $0x308] sm:$0xff]  ;;  %v2581_v27 = vcombine.low %v368_v14, %v384_v16  ;;  %v339_v61 = vld [vmem:[%s2835_s17 + $0x118] sm:$0xff] }
  0x18   : > { %v416_v24 = vld [vmem:[%s2835_s17 + $0x380] sm:$0xff]  ;;  %v417_v26 = vld [vmem:[%s2835_s17 + $0x388] sm:$0xff]  ;;  %v2583_v28 = vcombine.low %v369_v17, %v385_v18  ;;  %v355_v62 = vld [vmem:[%s2835_s17 + $0x198] sm:$0xff]  ;;  %v2554_v2 = vcombine.high %v338_v58, %v354_v59  ;;  %v2553_v8 = vcombine.low %v338_v58, %v354_v59 }
  0x19   : > { %v2614_v29 = vcombine.high %v400_v23, %v416_v24  ;;  %v2616_v30 = vcombine.high %v401_v25, %v417_v26  ;;  %v432_v31 = vld [vmem:[%s2835_s17 + $0x400] sm:$0xff]  ;;  %v433_v34 = vld [vmem:[%s2835_s17 + $0x408] sm:$0xff]  ;;  %v2613_v37 = vcombine.low %v400_v23, %v416_v24  ;;  %v2615_v38 = vcombine.low %v401_v25, %v417_v26  ;;  %v370_v4 = vld [vmem:[%s2835_s17 + $0x210] sm:$0xff] }
  0x1a   : > { %1479 = vmatpush1.bf16.msra.mxu0 %v2549_v19  ;;  %1532 = vmatpush1.bf16.msra.mxu1 %v2551_v20  ;;  %v448_v32 = vld [vmem:[%s2835_s17 + $0x480] sm:$0xff]  ;;  %v449_v35 = vld [vmem:[%s2835_s17 + $0x488] sm:$0xff]  ;;  %v2556_v3 = vcombine.high %v339_v61, %v355_v62  ;;  %v386_v5 = vld [vmem:[%s2835_s17 + $0x290] sm:$0xff]  ;;  %v2555_v10 = vcombine.low %v339_v61, %v355_v62 }
  0x1b   : > { %1480 = vmatprep.subr.bf16.mxu0 %v2582_v21  ;;  %1533 = vmatprep.subr.bf16.mxu1 %v2584_v22  ;;  %v464_v33 = vld [vmem:[%s2835_s17 + $0x500] sm:$0x11]  ;;  %v465_v36 = vld [vmem:[%s2835_s17 + $0x508] sm:$0x11]  ;;  %v2646_v39 = vcombine.high %v432_v31, %v448_v32  ;;  %v2648_v41 = vcombine.high %v433_v34, %v449_v35  ;;  %v2645_v44 = vcombine.low %v432_v31, %v448_v32  ;;  %v371_v6 = vld [vmem:[%s2835_s17 + $0x218] sm:$0xff] }
  0x1c   : > { %v2678_v40 = vcombine.high %v464_v33, %v464_v33  ;;  %v2680_v43 = vcombine.high %v465_v36, %v465_v36  ;;  %v2677_v45 = vcombine.low %v464_v33, %v464_v33  ;;  %v2647_v46 = vcombine.low %v433_v34, %v449_v35  ;;  %v387_v7 = vld [vmem:[%s2835_s17 + $0x298] sm:$0xff]  ;;  %v470_v9 = vld [vmem:[%s2835_s17 + $0x530] sm:$0x11]  ;;  %v2898_v20 = vld [vmem:[%s3733_s1 + $0x8] sm:$0xff]  }
  0x1d   : > { %v2679_v48 = vcombine.low %v465_v36, %v465_v36  ;;  %v2586_v11 = vcombine.high %v370_v4, %v386_v5  ;;  %v471_v12 = vld [vmem:[%s2835_s17 + $0x538] sm:$0x11]  ;;  %v2588_v13 = vcombine.high %v371_v6, %v387_v7  ;;  %v402_v14 = vld [vmem:[%s2835_s17 + $0x310] sm:$0xff]  ;;  %v2689_v16 = vcombine.low %v470_v9, %v470_v9  ;;  %v324_v62 = vld [vmem:[%s2835_s17 + $0xa0] sm:$0xff] }
  0x1e   : > { %1481 = vmatpush1.bf16.msra.mxu0 %v2581_v27  ;;  %1534 = vmatpush1.bf16.msra.mxu1 %v2583_v28  ;;  %v1384_v47 = vand.u32 %v2678_v40, %v2860_v42  ;;  %v1390_v49 = vand.u32 %v2680_v43, %v2860_v42  ;;  %v1381_v54 = vand.u32 %v2677_v45, %v2860_v42  ;;  %v418_v15 = vld [vmem:[%s2835_s17 + $0x390] sm:$0xff]  ;;  %v403_v18 = vld [vmem:[%s2835_s17 + $0x318] sm:$0xff]  ;;  %v473_v40 = vld [vmem:[%s2835_s17 + $0x548] sm:$0x11] }
  0x1f   : > { %1482 = vmatprep.subr.bf16.mxu0 %v2614_v29  ;;  %1535 = vmatprep.subr.bf16.mxu1 %v2616_v30  ;;  %v1387_v55 = vand.u32 %v2679_v48, %v2860_v42  ;;  %v2690_v17 = vcombine.high %v470_v9, %v470_v9  ;;  %v419_v19 = vld [vmem:[%s2835_s17 + $0x398] sm:$0xff]  ;;  %v2691_v21 = vcombine.low %v471_v12, %v471_v12  ;;  %v434_v28 = vld [vmem:[%s2835_s17 + $0x410] sm:$0xff]  ;;  %v356_v9 = vld [vmem:[%s2835_s17 + $0x1a0] sm:$0xff] }
  0x20   : > { %v2692_v22 = vcombine.high %v471_v12, %v471_v12  ;;  %v2585_v23 = vcombine.low %v370_v4, %v386_v5  ;;  %v2587_v24 = vcombine.low %v371_v6, %v387_v7  ;;  %v2904_v26 = vand.u32 %v2689_v16, %v2860_v42  ;;  %v450_v29 = vld [vmem:[%s2835_s17 + $0x490] sm:$0xff]  ;;  %v435_v33 = vld [vmem:[%s2835_s17 + $0x418] sm:$0xff]  ;;  %v357_v16 = vld [vmem:[%s2835_s17 + $0x1a8] sm:$0xff] }
  0x21   : > { %v2901_v25 = vand.u32 %v2690_v17, %v2860_v42  ;;  %v2618_v27 = vcombine.high %v402_v14, %v418_v15  ;;  %v2912_v31 = vand.u32 %v2691_v21, %v2860_v42  ;;  %v2620_v32 = vcombine.high %v403_v18, %v419_v19  ;;  %v451_v34 = vld [vmem:[%s2835_s17 + $0x498] sm:$0xff]  ;;  %v466_v35 = vld [vmem:[%s2835_s17 + $0x510] sm:$0x11] }
  0x22   : > { %1483 = vmatpush1.bf16.msra.mxu0 %v2613_v37  ;;  %1536 = vmatpush1.bf16.msra.mxu1 %v2615_v38  ;;  %v2909_v30 = vand.u32 %v2692_v22, %v2860_v42  ;;  %v467_v36 = vld [vmem:[%s2835_s17 + $0x518] sm:$0x11]  ;;  %v2617_v37 = vcombine.low %v402_v14, %v418_v15  ;;  %v2619_v38 = vcombine.low %v403_v18, %v419_v19  ;;  %v341_v15 = vld [vmem:[%s2835_s17 + $0x128] sm:$0xff] }
  0x23   : > { %1484 = vmatprep.subr.bf16.mxu0 %v2646_v39  ;;  %1537 = vmatprep.subr.bf16.mxu1 %v2648_v41  ;;  %v472_v39 = vld [vmem:[%s2835_s17 + $0x540] sm:$0x11]  ;;  %v2650_v41 = vcombine.high %v434_v28, %v450_v29  ;;  %v2652_v43 = vcombine.high %v435_v33, %v451_v34  ;;  %v2684_v45 = vcombine.high %v467_v36, %v467_v36 }
  0x24   : > { %v2649_v48 = vcombine.low %v434_v28, %v450_v29  ;;  %v2695_v50 = vcombine.low %v473_v40, %v473_v40  ;;  %v2696_v51 = vcombine.high %v473_v40, %v473_v40  ;;  %v2681_v52 = vcombine.low %v466_v35, %v466_v35  ;;  %v373_v29 = vld [vmem:[%s2835_s17 + $0x228] sm:$0xff]  ;;  %v404_v40 = vld [vmem:[%s2835_s17 + $0x320] sm:$0xff] }
  0x25   : > { %v2683_v53 = vcombine.low %v467_v36, %v467_v36  ;;  %v1402_v61 = vand.u32 %v2684_v45, %v2860_v42  ;;  %v2560_v28 = vcombine.high %v341_v15, %v357_v16  ;;  %v2559_v36 = vcombine.low %v341_v15, %v357_v16 }
  0x26   : > { %1485 = vmatpush1.bf16.msra.mxu0 %v2645_v44  ;;  %1538 = vmatpush1.bf16.msra.mxu1 %v2647_v46  ;;  %v2682_v44 = vcombine.high %v466_v35, %v466_v35  ;;  %v2693_v46 = vcombine.low %v472_v39, %v472_v39  ;;  %v2935_v58 = vand.u32 %v2696_v51, %v2860_v42 }
  0x27   : > { %1486 = vmatprep.subr.bf16.mxu0 %v1384_v47  ;;  %1539 = vmatprep.subr.bf16.mxu1 %v1390_v49  ;;  %v2694_v47 = vcombine.high %v472_v39, %v472_v39  ;;  %v2651_v49 = vcombine.low %v435_v33, %v451_v34  ;;  %v2938_v59 = vand.u32 %v2695_v50, %v2860_v42  ;;  %v476_v33 = vld [vmem:[%s2835_s17 + $0x560] sm:$0x11]  ;;  %v477_v34 = vld [vmem:[%s2835_s17 + $0x568] sm:$0x11] }
  0x28   : > { %v1393_v4 = vand.u32 %v2681_v52, %v2860_v42  ;;  %v1399_v5 = vand.u32 %v2683_v53, %v2860_v42  ;;  %v2701_v39 = vcombine.low %v476_v33, %v476_v33  ;;  %v2704_v45 = vcombine.high %v477_v34, %v477_v34  ;;  %v436_v50 = vld [vmem:[%s2835_s17 + $0x420] sm:$0xff] }
  0x2a   : > { %1487 = vmatpush1.bf16.msra.mxu0 %v1381_v54  ;;  %1540 = vmatpush1.bf16.msra.mxu1 %v1387_v55  ;;  %v2927_v54 = vand.u32 %v2694_v47, %v2860_v42  ;;  %v2930_v55 = vand.u32 %v2693_v46, %v2860_v42  ;;  %v405_v46 = vld [vmem:[%s2835_s17 + $0x328] sm:$0xff]  ;;  %v2988_v52 = vand.u32 %v2704_v45, %v2860_v42  ;;  %v358_v45 = vld [vmem:[%s2835_s17 + $0x1b0] sm:$0xff] }
  0x2b   : > { %1582 = vmatprep.subr.bf16.mxu0 %v2522_v56  ;;  %1635 = vmatprep.subr.bf16.mxu1 %v2524_v57  ;;  %v1396_v56 = vand.u32 %v2682_v44, %v2860_v42  ;;  %v308_v57 = vld [vmem:[%s2835_s17 + $0x20] sm:$0xff]  ;;  %v2703_v44 = vcombine.low %v477_v34, %v477_v34  ;;  %v421_v47 = vld [vmem:[%s2835_s17 + $0x3a8] sm:$0xff] }
  0x2c   : > { %v2526_v6 = vcombine.high %v308_v57, %v324_v62  ;;  %v2525_v14 = vcombine.low %v308_v57, %v324_v62  ;;  %v437_v62 = vld [vmem:[%s2835_s17 + $0x428] sm:$0xff] }
  0x2d   : > { %2709 = vmatmul.mubr.msk.bf16.vlgmr.msra.gmra.mrb[0].mxu0 %vm1370_vm1, %v2875_v60  ;;  %2711 = vmatmul.mubr.msk.bf16.vlgmr.msra.gmra.mrb[0].mxu1 %vm1370_vm1, %v2875_v60  ;;  %v2991_v53 = vand.u32 %v2703_v44, %v2860_v42  ;;  %v342_v44 = vld [vmem:[%s2835_s17 + $0x130] sm:$0xff] }
  0x2e   : > { %1583 = vmatpush1.bf16.msra.mxu0 %v2521_v63  ;;  %1636 = vmatpush1.bf16.msra.mxu1 %v2523_v1  ;;  %v309_v63 = vld [vmem:[%s2835_s17 + $0x28] sm:$0xff] }
  0x2f   : > { %1584 = vmatprep.subr.bf16.mxu0 %v2554_v2  ;;  %1637 = vmatprep.subr.bf16.mxu1 %v2556_v3  ;;  %v325_v1 = vld [vmem:[%s2835_s17 + $0xa8] sm:$0xff]  ;;  %v474_v2 = vld [vmem:[%s2835_s17 + $0x550] sm:$0x11]  ;;  %v475_v3 = vld [vmem:[%s2835_s17 + $0x558] sm:$0x11] }
  0x30   : > { %1518 = vmatprep.mubr.bf16.mxu0 %v2798_v0  ;;  %1571 = vmatprep.mubr.bf16.mxu1 %v2798_v0  ;;  %v2528_v7 = vcombine.high %v309_v63, %v325_v1  ;;  %v2699_v12 = vcombine.low %v475_v3, %v475_v3  ;;  %v2527_v22 = vcombine.low %v309_v63, %v325_v1  ;;  %v453_v63 = vld [vmem:[%s2835_s17 + $0x4a8] sm:$0xff] }
  0x31   : > { %v2624_v1 = vcombine.high %v405_v46, %v421_v47 }
  0x32   : > { %1585 = vmatpush1.bf16.msra.mxu0 %v2553_v8  ;;  %1638 = vmatpush1.bf16.msra.mxu1 %v2555_v10  ;;  %v340_v8 = vld [vmem:[%s2835_s17 + $0x120] sm:$0xff]  ;;  %v2697_v10 = vcombine.low %v474_v2, %v474_v2  ;;  %v2962_v21 = vand.u32 %v2699_v12, %v2860_v42 }
  0x33   : > { %1586 = vmatprep.subr.bf16.mxu0 %v2586_v11  ;;  %1639 = vmatprep.subr.bf16.mxu1 %v2588_v13  ;;  %v2698_v11 = vcombine.high %v474_v2, %v474_v2  ;;  %v2700_v13 = vcombine.high %v475_v3, %v475_v3  ;;  %v2557_v35 = vcombine.low %v340_v8, %v356_v9  ;;  %v468_v2 = vld [vmem:[%s2835_s17 + $0x520] sm:$0x11]  ;;  %v469_v3 = vld [vmem:[%s2835_s17 + $0x528] sm:$0x11] }
  0x34   : > { %v2959_v19 = vand.u32 %v2697_v10, %v2860_v42  ;;  %v2686_v10 = vcombine.high %v468_v2, %v468_v2 }
  0x35   : > { %2710 = vmatmul.mubr.msk.bf16.gmra.mrb[4].mxu0 %vm1370_vm1, %v2898_v20  ;;  %2712 = vmatmul.mubr.msk.bf16.gmra.mrb[4].mxu1 %vm1370_vm1, %v2898_v20  ;;  %v2953_v17 = vand.u32 %v2698_v11, %v2860_v42  ;;  %v2956_v18 = vand.u32 %v2700_v13, %v2860_v42  ;;  %v2688_v11 = vcombine.high %v469_v3, %v469_v3 }
  0x36   : > { %1587 = vmatpush1.bf16.msra.mxu0 %v2585_v23  ;;  %1640 = vmatpush1.bf16.msra.mxu1 %v2587_v24  ;;  %v2558_v23 = vcombine.high %v340_v8, %v356_v9  ;;  %v372_v24 = vld [vmem:[%s2835_s17 + $0x220] sm:$0xff]  ;;  %v2656_v9 = vcombine.high %v437_v62, %v453_v63 }
  0x37   : > { %1588 = vmatprep.subr.bf16.mxu0 %v2618_v27  ;;  %1641 = vmatprep.subr.bf16.mxu1 %v2620_v32  ;;  %v388_v27 = vld [vmem:[%s2835_s17 + $0x2a0] sm:$0xff]  ;;  %v389_v32 = vld [vmem:[%s2835_s17 + $0x2a8] sm:$0xff]  ;;  %v1414_v34 = vand.u32 %v2688_v11, %v2860_v42 }
  0x38   : > { %1614 = vmatprep.mubr.bf16.mxu0 %v2798_v0  ;;  %1667 = vmatprep.mubr.bf16.mxu1 %v2798_v0 }
  0x3a   : > { %1589 = vmatpush1.bf16.msra.mxu0 %v2617_v37  ;;  %1642 = vmatpush1.bf16.msra.mxu1 %v2619_v38  ;;  %v2590_v37 = vcombine.high %v372_v24, %v388_v27  ;;  %v2592_v38 = vcombine.high %v373_v29, %v389_v32 }
  0x3b   : > { %1590 = vmatprep.subr.bf16.mxu0 %v2650_v41  ;;  %1643 = vmatprep.subr.bf16.mxu1 %v2652_v43  ;;  %v420_v41 = vld [vmem:[%s2835_s17 + $0x3a0] sm:$0xff]  ;;  %v2702_v43 = vcombine.high %v476_v33, %v476_v33  ;;  %v2687_v33 = vcombine.low %v469_v3, %v469_v3 }
  0x3c   : > { %v2622_v57 = vcombine.high %v404_v40, %v420_v41 }
  0x3d   : > { %v2985_v51 = vand.u32 %v2702_v43, %v2860_v42 }
  0x3e   : > { %1591 = vmatpush1.bf16.msra.mxu0 %v2649_v48  ;;  %1644 = vmatpush1.bf16.msra.mxu1 %v2651_v49  ;;  %v2981_v48 = vand.u32 %v2701_v39, %v2860_v42  ;;  %v2589_v49 = vcombine.low %v372_v24, %v388_v27 }
  0x3f   : > { %1592 = vmatprep.subr.bf16.mxu0 %v1396_v56  ;;  %1645 = vmatprep.subr.bf16.mxu1 %v1402_v61  ;;  %v2591_v56 = vcombine.low %v373_v29, %v389_v32  ;;  %v452_v61 = vld [vmem:[%s2835_s17 + $0x4a0] sm:$0xff]  ;;  %v2655_v29 = vcombine.low %v437_v62, %v453_v63  ;;  %v1408_v32 = vand.u32 %v2686_v10, %v2860_v42  ;;  %v375_v62 = vld [vmem:[%s2835_s17 + $0x238] sm:$0xff] }
  0x40   : > { %v2654_v8 = vcombine.high %v436_v50, %v452_v61  ;;  %v2653_v16 = vcombine.low %v436_v50, %v452_v61  ;;  %v390_v61 = vld [vmem:[%s2835_s17 + $0x2b0] sm:$0xff]  ;;  %v391_v63 = vld [vmem:[%s2835_s17 + $0x2b8] sm:$0xff] }
  0x41   : > { %v2595_v10 = vcombine.low %v375_v62, %v391_v63 }
  0x42   : > { %1593 = vmatpush1.bf16.msra.mxu0 %v1393_v4  ;;  %1646 = vmatpush1.bf16.msra.mxu1 %v1399_v5  ;;  %v2621_v4 = vcombine.low %v404_v40, %v420_v41  ;;  %v478_v5 = vld [vmem:[%s2835_s17 + $0x570] sm:$0x11]  ;;  %v1411_v40 = vand.u32 %v2687_v33, %v2860_v42 }
  0x43   : > { %1688 = vmatprep.subr.bf16.mxu0 %v2526_v6  ;;  %1741 = vmatprep.subr.bf16.mxu1 %v2528_v7  ;;  %v479_v6 = vld [vmem:[%s2835_s17 + $0x578] sm:$0x11]  ;;  %v2623_v7 = vcombine.low %v405_v46, %v421_v47  ;;  %v2705_v12 = vcombine.low %v478_v5, %v478_v5  ;;  %v2706_v13 = vcombine.high %v478_v5, %v478_v5  ;;  %v406_v5 = vld [vmem:[%s2835_s17 + $0x330] sm:$0xff] }
  0x44   : > { %v2708_v15 = vcombine.high %v479_v6, %v479_v6  ;;  %v343_v46 = vld [vmem:[%s2835_s17 + $0x138] sm:$0xff] }
  0x45   : > { %2713 = vmatmul.mubr.msk.bf16.vlgmr.msra.gmra.mrb[8].mxu0 %vm1370_vm1, %v2875_v60  ;;  %2715 = vmatmul.mubr.msk.bf16.vlgmr.msra.gmra.mrb[8].mxu1 %vm1370_vm1, %v2875_v60  ;;  %v3010_v24 = vand.u32 %v2706_v13, %v2860_v42  ;;  %v359_v47 = vld [vmem:[%s2835_s17 + $0x1b8] sm:$0xff]  ;;  %v438_v13 = vld [vmem:[%s2835_s17 + $0x430] sm:$0xff] }
  0x46   : > { %1689 = vmatpush1.bf16.msra.mxu0 %v2525_v14  ;;  %1742 = vmatpush1.bf16.msra.mxu1 %v2527_v22  ;;  %v2707_v14 = vcombine.low %v479_v6, %v479_v6  ;;  %v3007_v22 = vand.u32 %v2705_v12, %v2860_v42  ;;  %v3013_v27 = vand.u32 %v2708_v15, %v2860_v42  ;;  %v422_v6 = vld [vmem:[%s2835_s17 + $0x3b0] sm:$0xff]  ;;  %v439_v15 = vld [vmem:[%s2835_s17 + $0x438] sm:$0xff] }
  0x47   : > { %1690 = vmatprep.subr.bf16.mxu0 %v2558_v23  ;;  %1743 = vmatprep.subr.bf16.mxu1 %v2560_v28  ;;  %v2685_v23 = vcombine.low %v468_v2, %v468_v2  ;;  %v2563_v2 = vcombine.low %v343_v46, %v359_v47  ;;  %v2626_v11 = vcombine.high %v406_v5, %v422_v6 }
  0x48   : > { %1624 = vmatprep.mubr.bf16.mxu0 %v2798_v0  ;;  %1677 = vmatprep.mubr.bf16.mxu1 %v2798_v0  ;;  %v3016_v28 = vand.u32 %v2707_v14, %v2860_v42  ;;  %v454_v14 = vld [vmem:[%s2835_s17 + $0x4b0] sm:$0xff] }
  0x49   : > { %v1405_v39 = vand.u32 %v2685_v23, %v2860_v42  ;;  %v2564_v42 = vcombine.high %v343_v46, %v359_v47  ;;  %v2625_v23 = vcombine.low %v406_v5, %v422_v6  ;;  %v361_v46 = vld [vmem:[%s2835_s17 + $0x1c8] sm:$0xff] }
  0x4a   : > { %1691 = vmatpush1.bf16.msra.mxu0 %v2557_v35  ;;  %1744 = vmatpush1.bf16.msra.mxu1 %v2559_v36  ;;  %v310_v35 = vld [vmem:[%s2835_s17 + $0x30] sm:$0xff] }
  0x4b   : > { %1692 = vmatprep.subr.bf16.mxu0 %v2590_v37  ;;  %1745 = vmatprep.subr.bf16.mxu1 %v2592_v38  ;;  %v326_v36 = vld [vmem:[%s2835_s17 + $0xb0] sm:$0xff]  ;;  %v311_v37 = vld [vmem:[%s2835_s17 + $0x38] sm:$0xff] }
  0x4c   : > { %v327_v38 = vld [vmem:[%s2835_s17 + $0xb8] sm:$0xff]  ;;  %v2530_v41 = vcombine.high %v310_v35, %v326_v36 }
  0x4d   : > { %2714 = vmatmul.mubr.msk.bf16.gmra.mrb[12].mxu0 %vm1370_vm1, %v2898_v20  ;;  %2716 = vmatmul.mubr.msk.bf16.gmra.mrb[12].mxu1 %vm1370_vm1, %v2898_v20  ;;  %v2532_v43 = vcombine.high %v311_v37, %v327_v38  ;;  %v2531_v50 = vcombine.low %v311_v37, %v327_v38  ;;  %v328_v37 = vld [vmem:[%s2835_s17 + $0xc0] sm:$0xff]  ;;  %v313_v38 = vld [vmem:[%s2835_s17 + $0x48] sm:$0xff] }
  0x4e   : > { %1693 = vmatpush1.bf16.msra.mxu0 %v2589_v49  ;;  %1746 = vmatpush1.bf16.msra.mxu1 %v2591_v56  ;;  %v2529_v49 = vcombine.low %v310_v35, %v326_v36  ;;  %v2562_v56 = vcombine.high %v342_v44, %v358_v45  ;;  %v312_v36 = vld [vmem:[%s2835_s17 + $0x40] sm:$0xff] }
  0x4f   : > { %1694 = vmatprep.subr.bf16.mxu0 %v2622_v57  ;;  %1747 = vmatprep.subr.bf16.mxu1 %v2624_v1  ;;  %v374_v57 = vld [vmem:[%s2835_s17 + $0x230] sm:$0xff]  ;;  %v2561_v1 = vcombine.low %v342_v44, %v358_v45  ;;  %v360_v44 = vld [vmem:[%s2835_s17 + $0x1c0] sm:$0xff]  ;;  %v345_v45 = vld [vmem:[%s2835_s17 + $0x148] sm:$0xff]  ;;  %v2533_v47 = vcombine.low %v312_v36, %v328_v37 }
  0x50   : > { %1720 = vmatprep.mubr.bf16.mxu0 %v2798_v0  ;;  %1773 = vmatprep.mubr.bf16.mxu1 %v2798_v0  ;;  %v2594_v3 = vcombine.high %v374_v57, %v390_v61 }
  0x52   : > { %1695 = vmatpush1.bf16.msra.mxu0 %v2621_v4  ;;  %1748 = vmatpush1.bf16.msra.mxu1 %v2623_v7  ;;  %v2596_v4 = vcombine.high %v375_v62, %v391_v63  ;;  %v407_v7 = vld [vmem:[%s2835_s17 + $0x338] sm:$0xff]  ;;  %v408_v63 = vld [vmem:[%s2835_s17 + $0x340] sm:$0xff] }
  0x53   : > { %1696 = vmatprep.subr.bf16.mxu0 %v2654_v8  ;;  %1749 = vmatprep.subr.bf16.mxu1 %v2656_v9  ;;  %v423_v8 = vld [vmem:[%s2835_s17 + $0x3b8] sm:$0xff]  ;;  %v2593_v9 = vcombine.low %v374_v57, %v390_v61  ;;  %v393_v57 = vld [vmem:[%s2835_s17 + $0x2c8] sm:$0xff] }
  0x54   : > { %v2628_v12 = vcombine.high %v407_v7, %v423_v8 }
  0x56   : > { %1697 = vmatpush1.bf16.msra.mxu0 %v2653_v16  ;;  %1750 = vmatpush1.bf16.msra.mxu1 %v2655_v29  ;;  %v455_v16 = vld [vmem:[%s2835_s17 + $0x4b8] sm:$0xff]  ;;  %v2627_v29 = vcombine.low %v407_v7, %v423_v8  ;;  %v440_v8 = vld [vmem:[%s2835_s17 + $0x440] sm:$0xff] }
  0x57   : > { %1698 = vmatprep.subr.bf16.mxu0 %v1408_v32  ;;  %1751 = vmatprep.subr.bf16.mxu1 %v1414_v34  ;;  %v2658_v32 = vcombine.high %v438_v13, %v454_v14  ;;  %v2660_v33 = vcombine.high %v439_v15, %v455_v16  ;;  %v2657_v34 = vcombine.low %v438_v13, %v454_v14 }
  0x58   : > { %v2659_v35 = vcombine.low %v439_v15, %v455_v16 }
  0x5a   : > { %1699 = vmatpush1.bf16.msra.mxu0 %v1405_v39  ;;  %1752 = vmatpush1.bf16.msra.mxu1 %v1411_v40  ;;  %v329_v39 = vld [vmem:[%s2835_s17 + $0xc8] sm:$0xff]  ;;  %v2534_v40 = vcombine.high %v312_v36, %v328_v37  ;;  %v346_v37 = vld [vmem:[%s2835_s17 + $0x150] sm:$0xff] }
  0x5b   : > { %1794 = vmatprep.subr.bf16.mxu0 %v2530_v41  ;;  %1847 = vmatprep.subr.bf16.mxu1 %v2532_v43  ;;  %v2536_v41 = vcombine.high %v313_v38, %v329_v39  ;;  %v344_v43 = vld [vmem:[%s2835_s17 + $0x140] sm:$0xff] }
  0x5d   : > { %2717 = vmatmul.mubr.msk.bf16.vlgmr.msra.gmra.mrb[16].mxu0 %vm1370_vm1, %v2875_v60  ;;  %2719 = vmatmul.mubr.msk.bf16.vlgmr.msra.gmra.mrb[16].mxu1 %vm1370_vm1, %v2875_v60 }
  0x5e   : > { %1795 = vmatpush1.bf16.msra.mxu0 %v2529_v49  ;;  %1848 = vmatpush1.bf16.msra.mxu1 %v2531_v50  ;;  %v2535_v49 = vcombine.low %v313_v38, %v329_v39  ;;  %v2568_v50 = vcombine.high %v345_v45, %v361_v46  ;;  %v362_v38 = vld [vmem:[%s2835_s17 + $0x1d0] sm:$0xff]  ;;  %v347_v39 = vld [vmem:[%s2835_s17 + $0x158] sm:$0xff] }
  0x5f   : > { %1796 = vmatprep.subr.bf16.mxu0 %v2562_v56  ;;  %1849 = vmatprep.subr.bf16.mxu1 %v2564_v42  ;;  %v392_v56 = vld [vmem:[%s2835_s17 + $0x2c0] sm:$0xff]  ;;  %v377_v42 = vld [vmem:[%s2835_s17 + $0x248] sm:$0xff] }
  0x60   : > { %1730 = vmatprep.mubr.bf16.mxu0 %v2798_v0  ;;  %1783 = vmatprep.mubr.bf16.mxu1 %v2798_v0  ;;  %v2600_v62 = vcombine.high %v377_v42, %v393_v57  ;;  %v2599_v5 = vcombine.low %v377_v42, %v393_v57  ;;  %v427_v42 = vld [vmem:[%s2835_s17 + $0x3d8] sm:$0xff] }
  0x62   : > { %1797 = vmatpush1.bf16.msra.mxu0 %v2561_v1  ;;  %1850 = vmatpush1.bf16.msra.mxu1 %v2563_v2  ;;  %v424_v1 = vld [vmem:[%s2835_s17 + $0x3c0] sm:$0xff]  ;;  %v409_v2 = vld [vmem:[%s2835_s17 + $0x348] sm:$0xff] }
  0x63   : > { %1798 = vmatprep.subr.bf16.mxu0 %v2594_v3  ;;  %1851 = vmatprep.subr.bf16.mxu1 %v2596_v4  ;;  %v425_v3 = vld [vmem:[%s2835_s17 + $0x3c8] sm:$0xff]  ;;  %v2630_v6 = vcombine.high %v408_v63, %v424_v1 }
  0x64   : > { %v2632_v7 = vcombine.high %v409_v2, %v425_v3  ;;  %v2631_v13 = vcombine.low %v409_v2, %v425_v3  ;;  %v459_v2 = vld [vmem:[%s2835_s17 + $0x4d8] sm:$0xff] }
  0x65   : > { %2718 = vmatmul.mubr.msk.bf16.gmra.mrb[20].mxu0 %vm1370_vm1, %v2898_v20  ;;  %2720 = vmatmul.mubr.msk.bf16.gmra.mrb[20].mxu1 %vm1370_vm1, %v2898_v20 }
  0x66   : > { %1799 = vmatpush1.bf16.msra.mxu0 %v2593_v9  ;;  %1852 = vmatpush1.bf16.msra.mxu1 %v2595_v10  ;;  %v456_v9 = vld [vmem:[%s2835_s17 + $0x4c0] sm:$0xff]  ;;  %v441_v10 = vld [vmem:[%s2835_s17 + $0x448] sm:$0xff] }
  0x67   : > { %1800 = vmatprep.subr.bf16.mxu0 %v2626_v11  ;;  %1853 = vmatprep.subr.bf16.mxu1 %v2628_v12  ;;  %v457_v11 = vld [vmem:[%s2835_s17 + $0x4c8] sm:$0xff]  ;;  %v2629_v12 = vcombine.low %v408_v63, %v424_v1  ;;  %v2662_v14 = vcombine.high %v440_v8, %v456_v9  ;;  %v2661_v16 = vcombine.low %v440_v8, %v456_v9  ;;  %v458_v63 = vld [vmem:[%s2835_s17 + $0x4d0] sm:$0xff]  ;;  %v443_v1 = vld [vmem:[%s2835_s17 + $0x458] sm:$0xff] }
  0x68   : > { %1826 = vmatprep.mubr.bf16.mxu0 %v2798_v0  ;;  %1879 = vmatprep.mubr.bf16.mxu1 %v2798_v0  ;;  %v2664_v15 = vcombine.high %v441_v10, %v457_v11  ;;  %v2667_v8 = vcombine.low %v443_v1, %v459_v2  ;;  %v316_v9 = vld [vmem:[%s2835_s17 + $0x60] sm:$0xff] }
  0x6a   : > { %1801 = vmatpush1.bf16.msra.mxu0 %v2625_v23  ;;  %1854 = vmatpush1.bf16.msra.mxu1 %v2627_v29  ;;  %v2663_v23 = vcombine.low %v441_v10, %v457_v11  ;;  %v314_v29 = vld [vmem:[%s2835_s17 + $0x50] sm:$0xff]  ;;  %v332_v10 = vld [vmem:[%s2835_s17 + $0xe0] sm:$0xff]  ;;  %v317_v11 = vld [vmem:[%s2835_s17 + $0x68] sm:$0xff] }
  0x6b   : > { %1802 = vmatprep.subr.bf16.mxu0 %v2658_v32  ;;  %1855 = vmatprep.subr.bf16.mxu1 %v2660_v33  ;;  %v330_v32 = vld [vmem:[%s2835_s17 + $0xd0] sm:$0xff]  ;;  %v315_v33 = vld [vmem:[%s2835_s17 + $0x58] sm:$0xff] }
  0x6e   : > { %1803 = vmatpush1.bf16.msra.mxu0 %v2657_v34  ;;  %1856 = vmatpush1.bf16.msra.mxu1 %v2659_v35  ;;  %v331_v34 = vld [vmem:[%s2835_s17 + $0xd8] sm:$0xff]  ;;  %v2538_v35 = vcombine.high %v314_v29, %v330_v32 }
  0x6f   : > { %1804 = vmatprep.subr.bf16.mxu0 %v2901_v25  ;;  %1857 = vmatprep.subr.bf16.mxu1 %v2909_v30  ;;  %v2566_v25 = vcombine.high %v344_v43, %v360_v44  ;;  %v376_v30 = vld [vmem:[%s2835_s17 + $0x240] sm:$0xff]  ;;  %v2540_v36 = vcombine.high %v315_v33, %v331_v34 }
  0x70   : > { %v2598_v61 = vcombine.high %v376_v30, %v392_v56  ;;  %v2597_v4 = vcombine.low %v376_v30, %v392_v56  ;;  %v426_v30 = vld [vmem:[%s2835_s17 + $0x3d0] sm:$0xff]  ;;  %v411_v56 = vld [vmem:[%s2835_s17 + $0x358] sm:$0xff] }
  0x72   : > { %1805 = vmatpush1.bf16.msra.mxu0 %v2904_v26  ;;  %1858 = vmatpush1.bf16.msra.mxu1 %v2912_v31  ;;  %v2565_v26 = vcombine.low %v344_v43, %v360_v44  ;;  %v2567_v31 = vcombine.low %v345_v45, %v361_v46  ;;  %v2539_v43 = vcombine.low %v315_v33, %v331_v34  ;;  %v394_v45 = vld [vmem:[%s2835_s17 + $0x2d0] sm:$0xff]  ;;  %v379_v46 = vld [vmem:[%s2835_s17 + $0x258] sm:$0xff] }
  0x73   : > { %1900 = vmatprep.subr.bf16.mxu0 %v2534_v40  ;;  %1953 = vmatprep.subr.bf16.mxu1 %v2536_v41  ;;  %v363_v40 = vld [vmem:[%s2835_s17 + $0x1d8] sm:$0xff]  ;;  %v2537_v41 = vcombine.low %v314_v29, %v330_v32  ;;  %v365_v29 = vld [vmem:[%s2835_s17 + $0x1e8] sm:$0xff]  ;;  %v2541_v32 = vcombine.low %v316_v9, %v332_v10 }
  0x74   : > { %v2572_v44 = vcombine.high %v347_v39, %v363_v40 }
  0x75   : > { %2721 = vmatmul.mubr.msk.bf16.vlgmr.msra.gmra.mrb[24].mxu0 %vm1370_vm1, %v2875_v60  ;;  %2723 = vmatmul.mubr.msk.bf16.vlgmr.msra.gmra.mrb[24].mxu1 %vm1370_vm1, %v2875_v60 }
  0x76   : > { %1901 = vmatpush1.bf16.msra.mxu0 %v2533_v47  ;;  %1954 = vmatpush1.bf16.msra.mxu1 %v2535_v49  ;;  %v395_v47 = vld [vmem:[%s2835_s17 + $0x2d8] sm:$0xff] }
  0x77   : > { %1902 = vmatprep.subr.bf16.mxu0 %v2566_v25  ;;  %1955 = vmatprep.subr.bf16.mxu1 %v2568_v50  ;;  %v2604_v25 = vcombine.high %v379_v46, %v395_v47  ;;  %v410_v50 = vld [vmem:[%s2835_s17 + $0x350] sm:$0xff] }
  0x78   : > { %1836 = vmatprep.mubr.bf16.mxu0 %v2798_v0  ;;  %1889 = vmatprep.mubr.bf16.mxu1 %v2798_v0  ;;  %v2633_v3 = vcombine.low %v410_v50, %v426_v30 }
  0x7a   : > { %1903 = vmatpush1.bf16.msra.mxu0 %v2565_v26  ;;  %1956 = vmatpush1.bf16.msra.mxu1 %v2567_v31  ;;  %v2603_v26 = vcombine.low %v379_v46, %v395_v47  ;;  %v2634_v31 = vcombine.high %v410_v50, %v426_v30  ;;  %v444_v46 = vld [vmem:[%s2835_s17 + $0x460] sm:$0xff] }
  0x7b   : > { %1904 = vmatprep.subr.bf16.mxu0 %v2598_v61  ;;  %1957 = vmatprep.subr.bf16.mxu1 %v2600_v62  ;;  %v2636_v61 = vcombine.high %v411_v56, %v427_v42  ;;  %v442_v62 = vld [vmem:[%s2835_s17 + $0x450] sm:$0xff]  ;;  %v460_v47 = vld [vmem:[%s2835_s17 + $0x4e0] sm:$0xff] }
  0x7c   : > { %v2670_v50 = vcombine.high %v444_v46, %v460_v47 }
  0x7d   : > { %2722 = vmatmul.mubr.msk.bf16.gmra.mrb[28].mxu0 %vm1370_vm1, %v2898_v20  ;;  %2724 = vmatmul.mubr.msk.bf16.gmra.mrb[28].mxu1 %vm1370_vm1, %v2898_v20 }
  0x7e   : > { %1905 = vmatpush1.bf16.msra.mxu0 %v2597_v4  ;;  %1958 = vmatpush1.bf16.msra.mxu1 %v2599_v5  ;;  %v2635_v4 = vcombine.low %v411_v56, %v427_v42  ;;  %v2666_v5 = vcombine.high %v442_v62, %v458_v63  ;;  %v2669_v56 = vcombine.low %v444_v46, %v460_v47 }
  0x7f   : > { %1906 = vmatprep.subr.bf16.mxu0 %v2630_v6  ;;  %1959 = vmatprep.subr.bf16.mxu1 %v2632_v7  ;;  %v2668_v6 = vcombine.high %v443_v1, %v459_v2  ;;  %v2665_v7 = vcombine.low %v442_v62, %v458_v63  ;;  %v350_v1 = vld [vmem:[%s2835_s17 + $0x170] sm:$0xff] }
  0x80   : > { %1932 = vmatprep.mubr.bf16.mxu0 %v2798_v0  ;;  %1985 = vmatprep.mubr.bf16.mxu1 %v2798_v0  ;;  %v366_v2 = vld [vmem:[%s2835_s17 + $0x1f0] sm:$0xff] }
  0x82   : > { %1907 = vmatpush1.bf16.msra.mxu0 %v2629_v12  ;;  %1960 = vmatpush1.bf16.msra.mxu1 %v2631_v13  ;;  %v333_v12 = vld [vmem:[%s2835_s17 + $0xe8] sm:$0xff]  ;;  %v2542_v13 = vcombine.high %v316_v9, %v332_v10  ;;  %v2788_v9 = vld [vmem:[%s3733_s1] sm:$0xff]   ;;  %v399_v10 = vld [vmem:[%s2835_s17 + $0x2f8] sm:$0xff] }
  0x83   : > { %1908 = vmatprep.subr.bf16.mxu0 %v2662_v14  ;;  %1961 = vmatprep.subr.bf16.mxu1 %v2664_v15  ;;  %v2544_v14 = vcombine.high %v317_v11, %v333_v12  ;;  %v348_v15 = vld [vmem:[%s2835_s17 + $0x160] sm:$0xff]  ;;  %v2543_v33 = vcombine.low %v317_v11, %v333_v12 }
  0x86   : > { %1909 = vmatpush1.bf16.msra.mxu0 %v2661_v16  ;;  %1962 = vmatpush1.bf16.msra.mxu1 %v2663_v23  ;;  %v364_v16 = vld [vmem:[%s2835_s17 + $0x1e0] sm:$0xff]  ;;  %v349_v23 = vld [vmem:[%s2835_s17 + $0x168] sm:$0xff] }
  0x87   : > { %1910 = vmatprep.subr.bf16.mxu0 %v2927_v54  ;;  %1963 = vmatprep.subr.bf16.mxu1 %v2935_v58  ;;  %v2570_v54 = vcombine.high %v346_v37, %v362_v38  ;;  %v378_v58 = vld [vmem:[%s2835_s17 + $0x250] sm:$0xff]  ;;  %v2576_v34 = vcombine.high %v349_v23, %v365_v29 }
  0x88   : > { %v2602_v49 = vcombine.high %v378_v58, %v394_v45  ;;  %v2601_v57 = vcombine.low %v378_v58, %v394_v45 }
  0x8a   : > { %1911 = vmatpush1.bf16.msra.mxu0 %v2930_v55  ;;  %1964 = vmatpush1.bf16.msra.mxu1 %v2938_v59  ;;  %v2569_v55 = vcombine.low %v346_v37, %v362_v38  ;;  %v2571_v59 = vcombine.low %v347_v39, %v363_v40  ;;  %v397_v37 = vld [vmem:[%s2835_s17 + $0x2e8] sm:$0xff]  ;;  %v412_v40 = vld [vmem:[%s2835_s17 + $0x360] sm:$0xff] }
  0x8b   : > { %2006 = vmatprep.subr.bf16.mxu0 %v2538_v35  ;;  %2059 = vmatprep.subr.bf16.mxu1 %v2540_v36  ;;  %v396_v35 = vld [vmem:[%s2835_s17 + $0x2e0] sm:$0xff]  ;;  %v381_v36 = vld [vmem:[%s2835_s17 + $0x268] sm:$0xff] }
  0x8c   : > { %v2608_v39 = vcombine.high %v381_v36, %v397_v37 }
  0x8d   : > { %2725 = vmatmul.mubr.msk.bf16.vlgmr.msra.gmra.mrb[32].mxu0 %vm1370_vm1, %v2875_v60  ;;  %2727 = vmatmul.mubr.msk.bf16.vlgmr.msra.gmra.mrb[32].mxu1 %vm1370_vm1, %v2875_v60 }
  0x8e   : > { %2007 = vmatpush1.bf16.msra.mxu0 %v2537_v41  ;;  %2060 = vmatpush1.bf16.msra.mxu1 %v2539_v43  ;;  %v428_v41 = vld [vmem:[%s2835_s17 + $0x3e0] sm:$0xff]  ;;  %v413_v43 = vld [vmem:[%s2835_s17 + $0x368] sm:$0xff] }
  0x8f   : > { %2008 = vmatprep.subr.bf16.mxu0 %v2570_v54  ;;  %2061 = vmatprep.subr.bf16.mxu1 %v2572_v44  ;;  %v429_v54 = vld [vmem:[%s2835_s17 + $0x3e8] sm:$0xff]  ;;  %v2607_v44 = vcombine.low %v381_v36, %v397_v37  ;;  %v2638_v58 = vcombine.high %v412_v40, %v428_v41  ;;  %v463_v36 = vld [vmem:[%s2835_s17 + $0x4f8] sm:$0xff] }
  0x90   : > { %1942 = vmatprep.mubr.bf16.mxu0 %v2798_v0  ;;  %1995 = vmatprep.mubr.bf16.mxu1 %v2798_v0  ;;  %v2640_v45 = vcombine.high %v413_v43, %v429_v54 }
  0x92   : > { %2009 = vmatpush1.bf16.msra.mxu0 %v2569_v55  ;;  %2062 = vmatpush1.bf16.msra.mxu1 %v2571_v59  ;;  %v445_v55 = vld [vmem:[%s2835_s17 + $0x468] sm:$0xff] }
  0x93   : > { %2010 = vmatprep.subr.bf16.mxu0 %v2602_v49  ;;  %2063 = vmatprep.subr.bf16.mxu1 %v2604_v25  ;;  %v461_v59 = vld [vmem:[%s2835_s17 + $0x4e8] sm:$0xff]  ;;  %v2637_v49 = vcombine.low %v412_v40, %v428_v41  ;;  %v2639_v25 = vcombine.low %v413_v43, %v429_v54  ;;  %v208_v41 = vld [vmem:[%s3734_s2 + $0x100] sm:$0xff] }
  0x94   : > { %v2672_v30 = vcombine.high %v445_v55, %v461_v59  ;;  %v2671_v42 = vcombine.low %v445_v55, %v461_v59  ;;  %v211_v59 = vld [vmem:[%s3734_s2 + $0x118] sm:$0xff] }
  0x95   : > { %2726 = vmatmul.mubr.msk.bf16.gmra.mrb[36].mxu0 %vm1370_vm1, %v2898_v20  ;;  %2728 = vmatmul.mubr.msk.bf16.gmra.mrb[36].mxu1 %vm1370_vm1, %v2898_v20 }
  0x96   : > { %2011 = vmatpush1.bf16.msra.mxu0 %v2601_v57  ;;  %2064 = vmatpush1.bf16.msra.mxu1 %v2603_v26  ;;  %v318_v57 = vld [vmem:[%s2835_s17 + $0x70] sm:$0xff] }
  0x97   : > { %2012 = vmatprep.subr.bf16.mxu0 %v2634_v31  ;;  %2065 = vmatprep.subr.bf16.mxu1 %v2636_v61  ;;  %v334_v26 = vld [vmem:[%s2835_s17 + $0xf0] sm:$0xff]  ;;  %v319_v31 = vld [vmem:[%s2835_s17 + $0x78] sm:$0xff] }
  0x98   : > { %2038 = vmatprep.mubr.bf16.mxu0 %v2798_v0  ;;  %2091 = vmatprep.mubr.bf16.mxu1 %v2798_v0  ;;  %v335_v61 = vld [vmem:[%s2835_s17 + $0xf8] sm:$0xff]  ;;  %v2546_v62 = vcombine.high %v318_v57, %v334_v26 }
  0x99   : > { %v2548_v63 = vcombine.high %v319_v31, %v335_v61 }
  0x9a   : > { %2013 = vmatpush1.bf16.msra.mxu0 %v2633_v3  ;;  %2066 = vmatpush1.bf16.msra.mxu1 %v2635_v4  ;;  %v351_v3 = vld [vmem:[%s2835_s17 + $0x178] sm:$0xff] }
  0x9b   : > { %2014 = vmatprep.subr.bf16.mxu0 %v2666_v5  ;;  %2067 = vmatprep.subr.bf16.mxu1 %v2668_v6  ;;  %v367_v4 = vld [vmem:[%s2835_s17 + $0x1f8] sm:$0xff]  ;;  %v2545_v5 = vcombine.low %v318_v57, %v334_v26  ;;  %v2547_v6 = vcombine.low %v319_v31, %v335_v61  ;;  %v240_v31 = vld [vmem:[%s3734_s2 + $0x200] sm:$0xff]  ;;  %v242_v61 = vld [vmem:[%s3734_s2 + $0x210] sm:$0xff] }
  0x9c   : > { %v2579_v11 = vcombine.low %v351_v3, %v367_v4 }
  0x9e   : > { %2015 = vmatpush1.bf16.msra.mxu0 %v2665_v7  ;;  %2068 = vmatpush1.bf16.msra.mxu1 %v2667_v8  ;;  %v2580_v7 = vcombine.high %v351_v3, %v367_v4  ;;  %v382_v8 = vld [vmem:[%s2835_s17 + $0x270] sm:$0xff] }
  0x9f   : > { %2016 = vmatprep.subr.bf16.mxu0 %v2953_v17  ;;  %2069 = vmatprep.subr.bf16.mxu1 %v2956_v18  ;;  %v2574_v17 = vcombine.high %v348_v15, %v364_v16  ;;  %v380_v18 = vld [vmem:[%s2835_s17 + $0x260] sm:$0xff] }
  0xa0   : > { %v2606_v38 = vcombine.high %v380_v18, %v396_v35 }
  0xa2   : > { %2017 = vmatpush1.bf16.msra.mxu0 %v2959_v19  ;;  %2070 = vmatpush1.bf16.msra.mxu1 %v2962_v21  ;;  %v2573_v19 = vcombine.low %v348_v15, %v364_v16  ;;  %v2575_v21 = vcombine.low %v349_v23, %v365_v29  ;;  %v430_v15 = vld [vmem:[%s2835_s17 + $0x3f0] sm:$0xff]  ;;  %v415_v16 = vld [vmem:[%s2835_s17 + $0x378] sm:$0xff] }
  0xa3   : > { %2112 = vmatprep.subr.bf16.mxu0 %v2542_v13  ;;  %2165 = vmatprep.subr.bf16.mxu1 %v2544_v14  ;;  %v414_v14 = vld [vmem:[%s2835_s17 + $0x370] sm:$0xff]  ;;  %v431_v23 = vld [vmem:[%s2835_s17 + $0x3f8] sm:$0xff] }
  0xa4   : > { %v2641_v37 = vcombine.low %v414_v14, %v430_v15 }
  0xa5   : > { %2729 = vmatmul.mubr.msk.bf16.vlgmr.msra.gmra.mrb[40].mxu0 %vm1370_vm1, %v2875_v60  ;;  %2731 = vmatmul.mubr.msk.bf16.vlgmr.msra.gmra.mrb[40].mxu1 %vm1370_vm1, %v2875_v60  ;;  %v2605_v60 = vcombine.low %v380_v18, %v396_v35  ;;  %v462_v18 = vld [vmem:[%s2835_s17 + $0x4f0] sm:$0xff]  ;;  %v447_v35 = vld [vmem:[%s2835_s17 + $0x478] sm:$0xff] }
  0xa6   : > { %2113 = vmatpush1.bf16.msra.mxu0 %v2541_v32  ;;  %2166 = vmatpush1.bf16.msra.mxu1 %v2543_v33  ;;  %v2642_v33 = vcombine.high %v414_v14, %v430_v15  ;;  %v2675_v40 = vcombine.low %v447_v35, %v463_v36 }
  0xa7   : > { %2114 = vmatprep.subr.bf16.mxu0 %v2574_v17  ;;  %2167 = vmatprep.subr.bf16.mxu1 %v2576_v34  ;;  %v2644_v17 = vcombine.high %v415_v16, %v431_v23  ;;  %v446_v34 = vld [vmem:[%s2835_s17 + $0x470] sm:$0xff] }
  0xa8   : > { %2048 = vmatprep.mubr.bf16.mxu0 %v2798_v0  ;;  %2101 = vmatprep.mubr.bf16.mxu1 %v2798_v0 }
  0xaa   : > { %2115 = vmatpush1.bf16.msra.mxu0 %v2573_v19  ;;  %2168 = vmatpush1.bf16.msra.mxu1 %v2575_v21  ;;  %v2789_v19 = vld [vmem:[%s3733_s1 + $0x8] sm:$0xff]   ;;  %v2643_v21 = vcombine.low %v415_v16, %v431_v23  ;;  %v180_v23 = vld [vmem:[%s3734_s2 + $0x20] sm:$0xff] }
  0xab   : > { %2116 = vmatprep.subr.bf16.mxu0 %v2606_v38  ;;  %2169 = vmatprep.subr.bf16.mxu1 %v2608_v39  ;;  %v2674_v38 = vcombine.high %v446_v34, %v462_v18  ;;  %v2676_v39 = vcombine.high %v447_v35, %v463_v36 }
  0xad   : > { %2730 = vmatmul.mubr.msk.bf16.gmra.mrb[44].mxu0 %vm1370_vm1, %v2898_v20  ;;  %2732 = vmatmul.mubr.msk.bf16.gmra.mrb[44].mxu1 %vm1370_vm1, %v2898_v20 }
  0xae   : > { %2117 = vmatpush1.bf16.msra.mxu0 %v2605_v60  ;;  %2170 = vmatpush1.bf16.msra.mxu1 %v2607_v44  ;;  %v210_v44 = vld [vmem:[%s3734_s2 + $0x110] sm:$0xff] }
  0xaf   : > { %2118 = vmatprep.subr.bf16.mxu0 %v2638_v58  ;;  %2171 = vmatprep.subr.bf16.mxu1 %v2640_v45  ;;  %v209_v58 = vld [vmem:[%s3734_s2 + $0x108] sm:$0xff] }
  0xb0   : > { %2144 = vmatprep.mubr.bf16.mxu0 %v2798_v0  ;;  %2197 = vmatprep.mubr.bf16.mxu1 %v2798_v0 }
  0xb2   : > { %2119 = vmatpush1.bf16.msra.mxu0 %v2637_v49  ;;  %2172 = vmatpush1.bf16.msra.mxu1 %v2639_v25 }
  0xb3   : > { %2120 = vmatprep.subr.bf16.mxu0 %v2670_v50  ;;  %2173 = vmatprep.subr.bf16.mxu1 %v2672_v30 }
  0xb6   : > { %2121 = vmatpush1.bf16.msra.mxu0 %v2669_v56  ;;  %2174 = vmatpush1.bf16.msra.mxu1 %v2671_v42 }
  0xb7   : > { %2122 = vmatprep.subr.bf16.mxu0 %v2985_v51  ;;  %2175 = vmatprep.subr.bf16.mxu1 %v2988_v52  ;;  %v2578_v51 = vcombine.high %v350_v1, %v366_v2  ;;  %v398_v52 = vld [vmem:[%s2835_s17 + $0x2f0] sm:$0xff] }
  0xb8   : > { %v2610_v12 = vcombine.high %v382_v8, %v398_v52  ;;  %v2609_v29 = vcombine.low %v382_v8, %v398_v52 }
  0xba   : > { %2123 = vmatpush1.bf16.msra.mxu0 %v2981_v48  ;;  %2176 = vmatpush1.bf16.msra.mxu1 %v2991_v53  ;;  %v383_v48 = vld [vmem:[%s2835_s17 + $0x278] sm:$0xff]  ;;  %v2577_v53 = vcombine.low %v350_v1, %v366_v2  ;;  %v272_v2 = vld [vmem:[%s3734_s2 + $0x300] sm:$0xff] }
  0xbb   : > { %2218 = vmatprep.subr.bf16.mxu0 %v2546_v62  ;;  %2271 = vmatprep.subr.bf16.mxu1 %v2548_v63  ;;  %v2612_v13 = vcombine.high %v383_v48, %v399_v10  ;;  %v2611_v32 = vcombine.low %v383_v48, %v399_v10  ;;  %v241_v62 = vld [vmem:[%s3734_s2 + $0x208] sm:$0xff]  ;;  %v243_v1 = vld [vmem:[%s3734_s2 + $0x218] sm:$0xff] }
  0xbc   : > { %v275_v48 = vld [vmem:[%s3734_s2 + $0x318] sm:$0xff] }
  0xbd   : > { %2733 = vmatmul.mubr.msk.bf16.vlgmr.msra.gmra.mrb[48].mxu0 %vm1370_vm1, %v2788_v9  ;;  %2735 = vmatmul.mubr.msk.bf16.vlgmr.msra.gmra.mrb[48].mxu1 %vm1370_vm1, %v2788_v9 }
  0xbe   : > { %2219 = vmatpush1.bf16.msra.mxu0 %v2545_v5  ;;  %2272 = vmatpush1.bf16.msra.mxu1 %v2547_v6  ;;  %v274_v6 = vld [vmem:[%s3734_s2 + $0x310] sm:$0xff] }
  0xbf   : > { %2220 = vmatprep.subr.bf16.mxu0 %v2578_v51  ;;  %2273 = vmatprep.subr.bf16.mxu1 %v2580_v7  ;;  %v273_v51 = vld [vmem:[%s3734_s2 + $0x308] sm:$0xff] }
  0xc0   : > { %2154 = vmatprep.mubr.bf16.mxu0 %v2798_v0  ;;  %2207 = vmatprep.mubr.bf16.mxu1 %v2798_v0 }
  0xc2   : > { %2221 = vmatpush1.bf16.msra.mxu0 %v2577_v53  ;;  %2274 = vmatpush1.bf16.msra.mxu1 %v2579_v11 }
  0xc3   : > { %2222 = vmatprep.subr.bf16.mxu0 %v2610_v12  ;;  %2275 = vmatprep.subr.bf16.mxu1 %v2612_v13 }
  0xc5   : > { %2734 = vmatmul.mubr.msk.bf16.gmra.mrb[52].mxu0 %vm1370_vm1, %v2898_v20  ;;  %2736 = vmatmul.mubr.msk.bf16.gmra.mrb[52].mxu1 %vm1370_vm1, %v2789_v19  ;;  %v2673_v20 = vcombine.low %v446_v34, %v462_v18  ;;  %v212_v34 = vld [vmem:[%s3734_s2 + $0x120] sm:$0xff] }
  0xc6   : > { %2223 = vmatpush1.bf16.msra.mxu0 %v2609_v29  ;;  %2276 = vmatpush1.bf16.msra.mxu1 %v2611_v32  ;;  %v182_v29 = vld [vmem:[%s3734_s2 + $0x30] sm:$0xff]  ;;  %v181_v32 = vld [vmem:[%s3734_s2 + $0x28] sm:$0xff] }
  0xc7   : > { %2224 = vmatprep.subr.bf16.mxu0 %v2642_v33  ;;  %2277 = vmatprep.subr.bf16.mxu1 %v2644_v17  ;;  %v183_v17 = vld [vmem:[%s3734_s2 + $0x38] sm:$0xff] }
  0xc8   : > { %2250 = vmatprep.mubr.bf16.mxu0 %v2798_v0  ;;  %2303 = vmatprep.mubr.bf16.mxu1 %v2798_v0 }
  0xca   : > { %2225 = vmatpush1.bf16.msra.mxu0 %v2641_v37  ;;  %2278 = vmatpush1.bf16.msra.mxu1 %v2643_v21  ;;  %v214_v37 = vld [vmem:[%s3734_s2 + $0x130] sm:$0xff] }
  0xcb   : > { %2226 = vmatprep.subr.bf16.mxu0 %v2674_v38  ;;  %2279 = vmatprep.subr.bf16.mxu1 %v2676_v39 }
  0xce   : > { %2227 = vmatpush1.bf16.msra.mxu0 %v2673_v20  ;;  %2280 = vmatpush1.bf16.msra.mxu1 %v2675_v40  ;;  %v215_v40 = vld [vmem:[%s3734_s2 + $0x138] sm:$0xff] }
  0xcf   : > { %2228 = vmatprep.subr.bf16.mxu0 %v3010_v24  ;;  %2281 = vmatprep.subr.bf16.mxu1 %v3013_v27  ;;  %v176_v24 = vld [vmem:[%s3734_s2] sm:$0xff]  ;;  %v177_v27 = vld [vmem:[%s3734_s2 + $0x8] sm:$0xff] }
  0xd2   : > { %2229 = vmatpush1.bf16.msra.mxu0 %v3007_v22  ;;  %2282 = vmatpush1.bf16.msra.mxu1 %v3016_v28  ;;  %v178_v22 = vld [vmem:[%s3734_s2 + $0x10] sm:$0xff]  ;;  %v179_v28 = vld [vmem:[%s3734_s2 + $0x18] sm:$0xff] }
  0xd5   : > { %2737 = vmatmul.mubr.msk.bf16.vlgmr.msra.gmra.mrb[56].mxu0 %vm1370_vm1, %v2788_v9  ;;  %2739 = vmatmul.mubr.msk.bf16.vlgmr.msra.gmra.mrb[56].mxu1 %vm1370_vm1, %v2788_v9 }
  0xd6   : > { %2260 = vmatprep.mubr.bf16.mxu0 %v2798_v0  ;;  %2313 = vmatprep.mubr.bf16.mxu1 %v2798_v0 }
  0xdd   : > { %2738 = vmatmul.mubr.msk.bf16.gmra.mrb[60].mxu0 %vm1370_vm1, %v2789_v19  ;;  %2740 = vmatmul.mubr.msk.bf16.gmra.mrb[60].mxu1 %vm1370_vm1, %v2789_v19  ;;  %v213_v19 = vld [vmem:[%s3734_s2 + $0x128] sm:$0xff] }
 0x100   : > { %v1510_v0 = vpop.f32.mrb[0].mxu0  ;;  %v1563_v54 = vpop.f32.mrb[0].mxu1 }
 0x101   : > { %v1511_v43 = vadd.f32 %v1510_v0, %v176_v24  ;;  %v1512_v60 = vpop.f32.mrb[1].mxu0  ;;  %v1564_v45 = vadd.f32 %v1563_v54, %v178_v22  ;;  %v1565_v47 = vpop.f32.mrb[1].mxu1 }
 0x102   : > { %v1513_v46 = vadd.f32 %v1512_v60, %v177_v27  ;;  %v1514_v55 = vpop.f32.mrb[2].mxu0  ;;  %v1566_v49 = vadd.f32 %v1565_v47, %v179_v28  ;;  %v1567_v50 = vpop.f32.mrb[2].mxu1  ;;  %v244_v60 = vld [vmem:[%s3734_s2 + $0x220] sm:$0xff] }
 0x103   : > { %2324 = vst [vmem:[%s3224_s8] sm:$0xff] %v1511_v43  ;;  %v1515_v25 = vadd.f32 %v1514_v55, %v208_v41  ;;  %v1516_v30 = vpop.f32.mrb[3].mxu0  ;;  %2326 = vst [vmem:[%s3224_s8 + $0x10] sm:$0xff] %v1564_v45  ;;  %v1568_v56 = vadd.f32 %v1567_v50, %v210_v44  ;;  %v1569_v57 = vpop.f32.mrb[3].mxu1  ;;  %v246_v44 = vld [vmem:[%s3734_s2 + $0x230] sm:$0xff]  ;;  %v276_v47 = vld [vmem:[%s3734_s2 + $0x320] sm:$0xff] }
 0x104   : > { %2325 = vst [vmem:[%s3224_s8 + $0x8] sm:$0xff] %v1513_v46  ;;  %v1517_v42 = vadd.f32 %v1516_v30, %v209_v58  ;;  %2327 = vst [vmem:[%s3224_s8 + $0x18] sm:$0xff] %v1566_v49  ;;  %v1570_v26 = vadd.f32 %v1569_v57, %v211_v59  ;;  %v245_v58 = vld [vmem:[%s3734_s2 + $0x228] sm:$0xff]  ;;  %v247_v46 = vld [vmem:[%s3734_s2 + $0x238] sm:$0xff] }
 0x105   : > { %2356 = vst [vmem:[%s3224_s8 + $0x100] sm:$0xff] %v1515_v25  ;;  %2358 = vst [vmem:[%s3224_s8 + $0x110] sm:$0xff] %v1568_v56  ;;  %v278_v25 = vld [vmem:[%s3734_s2 + $0x330] sm:$0xff]  ;;  %v277_v50 = vld [vmem:[%s3734_s2 + $0x328] sm:$0xff] }
 0x106   : > { %2357 = vst [vmem:[%s3224_s8 + $0x108] sm:$0xff] %v1517_v42  ;;  %2359 = vst [vmem:[%s3224_s8 + $0x118] sm:$0xff] %v1570_v26  ;;  %v279_v26 = vld [vmem:[%s3734_s2 + $0x338] sm:$0xff] }
 0x108   : > { %v1520_v63 = vpop.f32.mrb[4].mxu0  ;;  %v1573_v4 = vpop.f32.mrb[4].mxu1 }
 0x109   : > { %v1521_v3 = vadd.f32 %v1520_v63, %v240_v31  ;;  %v1522_v5 = vpop.f32.mrb[5].mxu0  ;;  %v1574_v7 = vadd.f32 %v1573_v4, %v242_v61  ;;  %v1575_v52 = vpop.f32.mrb[5].mxu1 }
 0x10a   : > { %v1523_v8 = vadd.f32 %v1522_v5, %v241_v62  ;;  %v1524_v9 = vpop.f32.mrb[6].mxu0  ;;  %v1576_v10 = vadd.f32 %v1575_v52, %v243_v1  ;;  %v1577_v11 = vpop.f32.mrb[6].mxu1  ;;  %v184_v5 = vld [vmem:[%s3734_s2 + $0x40] sm:$0xff] }
 0x10b   : > { %2388 = vst [vmem:[%s3224_s8 + $0x200] sm:$0xff] %v1521_v3  ;;  %v1525_v53 = vadd.f32 %v1524_v9, %v272_v2  ;;  %v1526_v12 = vpop.f32.mrb[7].mxu0  ;;  %2390 = vst [vmem:[%s3224_s8 + $0x210] sm:$0xff] %v1574_v7  ;;  %v1578_v13 = vadd.f32 %v1577_v11, %v274_v6  ;;  %v1579_v15 = vpop.f32.mrb[7].mxu1  ;;  %v186_v6 = vld [vmem:[%s3734_s2 + $0x50] sm:$0xff]  ;;  %v216_v52 = vld [vmem:[%s3734_s2 + $0x140] sm:$0xff] }
 0x10c   : > { %2389 = vst [vmem:[%s3224_s8 + $0x208] sm:$0xff] %v1523_v8  ;;  %v1527_v14 = vadd.f32 %v1526_v12, %v273_v51  ;;  %2391 = vst [vmem:[%s3224_s8 + $0x218] sm:$0xff] %v1576_v10  ;;  %v1580_v16 = vadd.f32 %v1579_v15, %v275_v48  ;;  %v185_v51 = vld [vmem:[%s3734_s2 + $0x48] sm:$0xff]  ;;  %v187_v8 = vld [vmem:[%s3734_s2 + $0x58] sm:$0xff] }
 0x10d   : > { %2420 = vst [vmem:[%s3224_s8 + $0x300] sm:$0xff] %v1525_v53  ;;  %2422 = vst [vmem:[%s3224_s8 + $0x310] sm:$0xff] %v1578_v13  ;;  %v218_v53 = vld [vmem:[%s3734_s2 + $0x150] sm:$0xff]  ;;  %v217_v11 = vld [vmem:[%s3734_s2 + $0x148] sm:$0xff] }
 0x10e   : > { %2421 = vst [vmem:[%s3224_s8 + $0x308] sm:$0xff] %v1527_v14  ;;  %2423 = vst [vmem:[%s3224_s8 + $0x318] sm:$0xff] %v1580_v16  ;;  %v219_v16 = vld [vmem:[%s3734_s2 + $0x158] sm:$0xff] }
 0x118   : > { %v1616_v33 = vpop.f32.mrb[8].mxu0  ;;  %v1669_v35 = vpop.f32.mrb[8].mxu1 }
 0x119   : > { %v1617_v18 = vadd.f32 %v1616_v33, %v180_v23  ;;  %v1618_v36 = vpop.f32.mrb[9].mxu0  ;;  %v1670_v21 = vadd.f32 %v1669_v35, %v182_v29  ;;  %v1671_v39 = vpop.f32.mrb[9].mxu1 }
 0x11a   : > { %v1619_v38 = vadd.f32 %v1618_v36, %v181_v32  ;;  %v1620_v20 = vpop.f32.mrb[10].mxu0  ;;  %v1672_v24 = vadd.f32 %v1671_v39, %v183_v17  ;;  %v1673_v27 = vpop.f32.mrb[10].mxu1  ;;  %v248_v36 = vld [vmem:[%s3734_s2 + $0x240] sm:$0xff] }
 0x11b   : > { %2328 = vst [vmem:[%s3224_s8 + $0x20] sm:$0xff] %v1617_v18  ;;  %v1621_v22 = vadd.f32 %v1620_v20, %v212_v34  ;;  %v1622_v0 = vpop.f32.mrb[11].mxu0  ;;  %2330 = vst [vmem:[%s3224_s8 + $0x30] sm:$0xff] %v1670_v21  ;;  %v1674_v28 = vadd.f32 %v1673_v27, %v214_v37  ;;  %v1675_v43 = vpop.f32.mrb[11].mxu1  ;;  %v250_v37 = vld [vmem:[%s3734_s2 + $0x250] sm:$0xff]  ;;  %v280_v39 = vld [vmem:[%s3734_s2 + $0x340] sm:$0xff] }
 0x11c   : > { %2329 = vst [vmem:[%s3224_s8 + $0x28] sm:$0xff] %v1619_v38  ;;  %v1623_v41 = vadd.f32 %v1622_v0, %v213_v19  ;;  %2331 = vst [vmem:[%s3224_s8 + $0x38] sm:$0xff] %v1672_v24  ;;  %v1676_v54 = vadd.f32 %v1675_v43, %v215_v40  ;;  %v249_v19 = vld [vmem:[%s3734_s2 + $0x248] sm:$0xff]  ;;  %v251_v38 = vld [vmem:[%s3734_s2 + $0x258] sm:$0xff] }
 0x11d   : > { %2360 = vst [vmem:[%s3224_s8 + $0x120] sm:$0xff] %v1621_v22  ;;  %2362 = vst [vmem:[%s3224_s8 + $0x130] sm:$0xff] %v1674_v28  ;;  %v282_v22 = vld [vmem:[%s3734_s2 + $0x350] sm:$0xff]  ;;  %v281_v27 = vld [vmem:[%s3734_s2 + $0x348] sm:$0xff] }
 0x11e   : > { %2361 = vst [vmem:[%s3224_s8 + $0x128] sm:$0xff] %v1623_v41  ;;  %2363 = vst [vmem:[%s3224_s8 + $0x138] sm:$0xff] %v1676_v54  ;;  %v283_v54 = vld [vmem:[%s3734_s2 + $0x358] sm:$0xff] }
 0x120   : > { %v1626_v45 = vpop.f32.mrb[12].mxu0  ;;  %v1679_v59 = vpop.f32.mrb[12].mxu1 }
 0x121   : > { %v1627_v55 = vadd.f32 %v1626_v45, %v244_v60  ;;  %v1628_v49 = vpop.f32.mrb[13].mxu0  ;;  %v1680_v30 = vadd.f32 %v1679_v59, %v246_v44  ;;  %v1681_v42 = vpop.f32.mrb[13].mxu1 }
 0x122   : > { %v1629_v56 = vadd.f32 %v1628_v49, %v245_v58  ;;  %v1630_v57 = vpop.f32.mrb[14].mxu0  ;;  %v1682_v31 = vadd.f32 %v1681_v42, %v247_v46  ;;  %v1683_v62 = vpop.f32.mrb[14].mxu1  ;;  %v188_v49 = vld [vmem:[%s3734_s2 + $0x60] sm:$0xff] }
 0x123   : > { %2392 = vst [vmem:[%s3224_s8 + $0x220] sm:$0xff] %v1627_v55  ;;  %v1631_v61 = vadd.f32 %v1630_v57, %v276_v47  ;;  %v1632_v63 = vpop.f32.mrb[15].mxu0  ;;  %2394 = vst [vmem:[%s3224_s8 + $0x230] sm:$0xff] %v1680_v30  ;;  %v1684_v1 = vadd.f32 %v1683_v62, %v278_v25  ;;  %v1685_v3 = vpop.f32.mrb[15].mxu1  ;;  %v190_v25 = vld [vmem:[%s3734_s2 + $0x70] sm:$0xff]  ;;  %v220_v42 = vld [vmem:[%s3734_s2 + $0x160] sm:$0xff] }
 0x124   : > { %2393 = vst [vmem:[%s3224_s8 + $0x228] sm:$0xff] %v1629_v56  ;;  %v1633_v2 = vadd.f32 %v1632_v63, %v277_v50  ;;  %2395 = vst [vmem:[%s3224_s8 + $0x238] sm:$0xff] %v1682_v31  ;;  %v1686_v4 = vadd.f32 %v1685_v3, %v279_v26  ;;  %v189_v50 = vld [vmem:[%s3734_s2 + $0x68] sm:$0xff]  ;;  %v191_v56 = vld [vmem:[%s3734_s2 + $0x78] sm:$0xff] }
 0x125   : > { %2424 = vst [vmem:[%s3224_s8 + $0x320] sm:$0xff] %v1631_v61  ;;  %2426 = vst [vmem:[%s3224_s8 + $0x330] sm:$0xff] %v1684_v1  ;;  %v222_v61 = vld [vmem:[%s3734_s2 + $0x170] sm:$0xff]  ;;  %v221_v62 = vld [vmem:[%s3734_s2 + $0x168] sm:$0xff] }
 0x126   : > { %2425 = vst [vmem:[%s3224_s8 + $0x328] sm:$0xff] %v1633_v2  ;;  %2427 = vst [vmem:[%s3224_s8 + $0x338] sm:$0xff] %v1686_v4  ;;  %v223_v4 = vld [vmem:[%s3734_s2 + $0x178] sm:$0xff] }
 0x130   : > { %v1722_v7 = vpop.f32.mrb[16].mxu0  ;;  %v1775_v48 = vpop.f32.mrb[16].mxu1 }
 0x131   : > { %v1723_v9 = vadd.f32 %v1722_v7, %v184_v5  ;;  %v1724_v10 = vpop.f32.mrb[17].mxu0  ;;  %v1776_v12 = vadd.f32 %v1775_v48, %v186_v6  ;;  %v1777_v14 = vpop.f32.mrb[17].mxu1 }
 0x132   : > { %v1725_v13 = vadd.f32 %v1724_v10, %v185_v51  ;;  %v1726_v15 = vpop.f32.mrb[18].mxu0  ;;  %v1778_v23 = vadd.f32 %v1777_v14, %v187_v8  ;;  %v1779_v32 = vpop.f32.mrb[18].mxu1  ;;  %v252_v10 = vld [vmem:[%s3734_s2 + $0x260] sm:$0xff] }
 0x133   : > { %2332 = vst [vmem:[%s3224_s8 + $0x40] sm:$0xff] %v1723_v9  ;;  %v1727_v29 = vadd.f32 %v1726_v15, %v216_v52  ;;  %v1728_v33 = vpop.f32.mrb[19].mxu0  ;;  %2334 = vst [vmem:[%s3224_s8 + $0x50] sm:$0xff] %v1776_v12  ;;  %v1780_v17 = vadd.f32 %v1779_v32, %v218_v53  ;;  %v1781_v18 = vpop.f32.mrb[19].mxu1  ;;  %v254_v53 = vld [vmem:[%s3734_s2 + $0x270] sm:$0xff]  ;;  %v284_v14 = vld [vmem:[%s3734_s2 + $0x360] sm:$0xff] }
 0x134   : > { %2333 = vst [vmem:[%s3224_s8 + $0x48] sm:$0xff] %v1725_v13  ;;  %v1729_v34 = vadd.f32 %v1728_v33, %v217_v11  ;;  %2335 = vst [vmem:[%s3224_s8 + $0x58] sm:$0xff] %v1778_v23  ;;  %v1782_v35 = vadd.f32 %v1781_v18, %v219_v16  ;;  %v253_v11 = vld [vmem:[%s3734_s2 + $0x268] sm:$0xff]  ;;  %v255_v13 = vld [vmem:[%s3734_s2 + $0x278] sm:$0xff] }
 0x135   : > { %2364 = vst [vmem:[%s3224_s8 + $0x140] sm:$0xff] %v1727_v29  ;;  %2366 = vst [vmem:[%s3224_s8 + $0x150] sm:$0xff] %v1780_v17  ;;  %v286_v29 = vld [vmem:[%s3734_s2 + $0x370] sm:$0xff]  ;;  %v285_v32 = vld [vmem:[%s3734_s2 + $0x368] sm:$0xff] }
 0x136   : > { %2365 = vst [vmem:[%s3224_s8 + $0x148] sm:$0xff] %v1729_v34  ;;  %2367 = vst [vmem:[%s3224_s8 + $0x158] sm:$0xff] %v1782_v35  ;;  %v287_v35 = vld [vmem:[%s3734_s2 + $0x378] sm:$0xff] }
 0x138   : > { %v1732_v21 = vpop.f32.mrb[20].mxu0  ;;  %v1785_v40 = vpop.f32.mrb[20].mxu1 }
 0x139   : > { %v1733_v20 = vadd.f32 %v1732_v21, %v248_v36  ;;  %v1734_v24 = vpop.f32.mrb[21].mxu0  ;;  %v1786_v0 = vadd.f32 %v1785_v40, %v250_v37  ;;  %v1787_v41 = vpop.f32.mrb[21].mxu1 }
 0x13a   : > { %v1735_v28 = vadd.f32 %v1734_v24, %v249_v19  ;;  %v1736_v43 = vpop.f32.mrb[22].mxu0  ;;  %v1788_v60 = vadd.f32 %v1787_v41, %v251_v38  ;;  %v1789_v58 = vpop.f32.mrb[22].mxu1  ;;  %v192_v24 = vld [vmem:[%s3734_s2 + $0x80] sm:$0xff] }
 0x13b   : > { %2396 = vst [vmem:[%s3224_s8 + $0x240] sm:$0xff] %v1733_v20  ;;  %v1737_v44 = vadd.f32 %v1736_v43, %v280_v39  ;;  %v1738_v45 = vpop.f32.mrb[23].mxu0  ;;  %2398 = vst [vmem:[%s3224_s8 + $0x250] sm:$0xff] %v1786_v0  ;;  %v1790_v46 = vadd.f32 %v1789_v58, %v282_v22  ;;  %v1791_v55 = vpop.f32.mrb[23].mxu1  ;;  %v194_v22 = vld [vmem:[%s3734_s2 + $0x90] sm:$0xff]  ;;  %v224_v41 = vld [vmem:[%s3734_s2 + $0x180] sm:$0xff] }
 0x13c   : > { %2397 = vst [vmem:[%s3224_s8 + $0x248] sm:$0xff] %v1735_v28  ;;  %v1739_v47 = vadd.f32 %v1738_v45, %v281_v27  ;;  %2399 = vst [vmem:[%s3224_s8 + $0x258] sm:$0xff] %v1788_v60  ;;  %v1792_v59 = vadd.f32 %v1791_v55, %v283_v54  ;;  %v193_v27 = vld [vmem:[%s3734_s2 + $0x88] sm:$0xff]  ;;  %v195_v28 = vld [vmem:[%s3734_s2 + $0x98] sm:$0xff] }
 0x13d   : > { %2428 = vst [vmem:[%s3224_s8 + $0x340] sm:$0xff] %v1737_v44  ;;  %2430 = vst [vmem:[%s3224_s8 + $0x350] sm:$0xff] %v1790_v46  ;;  %v226_v44 = vld [vmem:[%s3734_s2 + $0x190] sm:$0xff]  ;;  %v225_v58 = vld [vmem:[%s3734_s2 + $0x188] sm:$0xff] }
 0x13e   : > { %2429 = vst [vmem:[%s3224_s8 + $0x348] sm:$0xff] %v1739_v47  ;;  %2431 = vst [vmem:[%s3224_s8 + $0x358] sm:$0xff] %v1792_v59  ;;  %v227_v59 = vld [vmem:[%s3734_s2 + $0x198] sm:$0xff] }
 0x148   : > { %v1828_v30 = vpop.f32.mrb[24].mxu0  ;;  %v1881_v26 = vpop.f32.mrb[24].mxu1 }
 0x149   : > { %v1829_v57 = vadd.f32 %v1828_v30, %v188_v49  ;;  %v1830_v31 = vpop.f32.mrb[25].mxu0  ;;  %v1882_v63 = vadd.f32 %v1881_v26, %v190_v25  ;;  %v1883_v2 = vpop.f32.mrb[25].mxu1 }
 0x14a   : > { %v1831_v1 = vadd.f32 %v1830_v31, %v189_v50  ;;  %v1832_v3 = vpop.f32.mrb[26].mxu0  ;;  %v1884_v5 = vadd.f32 %v1883_v2, %v191_v56  ;;  %v1885_v51 = vpop.f32.mrb[26].mxu1  ;;  %v256_v31 = vld [vmem:[%s3734_s2 + $0x280] sm:$0xff] }
 0x14b   : > { %2336 = vst [vmem:[%s3224_s8 + $0x60] sm:$0xff] %v1829_v57  ;;  %v1833_v6 = vadd.f32 %v1832_v3, %v220_v42  ;;  %v1834_v7 = vpop.f32.mrb[27].mxu0  ;;  %2338 = vst [vmem:[%s3224_s8 + $0x70] sm:$0xff] %v1882_v63  ;;  %v1886_v8 = vadd.f32 %v1885_v51, %v222_v61  ;;  %v1887_v9 = vpop.f32.mrb[27].mxu1  ;;  %v258_v61 = vld [vmem:[%s3734_s2 + $0x290] sm:$0xff]  ;;  %v288_v2 = vld [vmem:[%s3734_s2 + $0x380] sm:$0xff] }
 0x14c   : > { %2337 = vst [vmem:[%s3224_s8 + $0x68] sm:$0xff] %v1831_v1  ;;  %v1835_v52 = vadd.f32 %v1834_v7, %v221_v62  ;;  %2339 = vst [vmem:[%s3224_s8 + $0x78] sm:$0xff] %v1884_v5  ;;  %v1888_v48 = vadd.f32 %v1887_v9, %v223_v4  ;;  %v257_v62 = vld [vmem:[%s3734_s2 + $0x288] sm:$0xff]  ;;  %v259_v1 = vld [vmem:[%s3734_s2 + $0x298] sm:$0xff] }
 0x14d   : > { %2368 = vst [vmem:[%s3224_s8 + $0x160] sm:$0xff] %v1833_v6  ;;  %2370 = vst [vmem:[%s3224_s8 + $0x170] sm:$0xff] %v1886_v8  ;;  %v290_v6 = vld [vmem:[%s3734_s2 + $0x390] sm:$0xff]  ;;  %v289_v51 = vld [vmem:[%s3734_s2 + $0x388] sm:$0xff] }
 0x14e   : > { %2369 = vst [vmem:[%s3224_s8 + $0x168] sm:$0xff] %v1835_v52  ;;  %2371 = vst [vmem:[%s3224_s8 + $0x178] sm:$0xff] %v1888_v48  ;;  %v291_v48 = vld [vmem:[%s3734_s2 + $0x398] sm:$0xff] }
 0x150   : > { %v1838_v12 = vpop.f32.mrb[28].mxu0  ;;  %v1891_v16 = vpop.f32.mrb[28].mxu1 }
 0x151   : > { %v1839_v15 = vadd.f32 %v1838_v12, %v252_v10  ;;  %v1840_v23 = vpop.f32.mrb[29].mxu0  ;;  %v1892_v33 = vadd.f32 %v1891_v16, %v254_v53  ;;  %v1893_v34 = vpop.f32.mrb[29].mxu1 }
 0x152   : > { %v1841_v17 = vadd.f32 %v1840_v23, %v253_v11  ;;  %v1842_v18 = vpop.f32.mrb[30].mxu0  ;;  %v1894_v36 = vadd.f32 %v1893_v34, %v255_v13  ;;  %v1895_v19 = vpop.f32.mrb[30].mxu1  ;;  %v196_v23 = vld [vmem:[%s3734_s2 + $0xa0] sm:$0xff] }
 0x153   : > { %2400 = vst [vmem:[%s3224_s8 + $0x260] sm:$0xff] %v1839_v15  ;;  %v1843_v37 = vadd.f32 %v1842_v18, %v284_v14  ;;  %v1844_v21 = vpop.f32.mrb[31].mxu0  ;;  %2402 = vst [vmem:[%s3224_s8 + $0x270] sm:$0xff] %v1892_v33  ;;  %v1896_v38 = vadd.f32 %v1895_v19, %v286_v29  ;;  %v1897_v20 = vpop.f32.mrb[31].mxu1  ;;  %v198_v29 = vld [vmem:[%s3734_s2 + $0xb0] sm:$0xff]  ;;  %v228_v34 = vld [vmem:[%s3734_s2 + $0x1a0] sm:$0xff] }
 0x154   : > { %2401 = vst [vmem:[%s3224_s8 + $0x268] sm:$0xff] %v1841_v17  ;;  %v1845_v39 = vadd.f32 %v1844_v21, %v285_v32  ;;  %2403 = vst [vmem:[%s3224_s8 + $0x278] sm:$0xff] %v1894_v36  ;;  %v1898_v40 = vadd.f32 %v1897_v20, %v287_v35  ;;  %v197_v32 = vld [vmem:[%s3734_s2 + $0xa8] sm:$0xff]  ;;  %v199_v17 = vld [vmem:[%s3734_s2 + $0xb8] sm:$0xff] }
 0x155   : > { %2432 = vst [vmem:[%s3224_s8 + $0x360] sm:$0xff] %v1843_v37  ;;  %2434 = vst [vmem:[%s3224_s8 + $0x370] sm:$0xff] %v1896_v38  ;;  %v230_v37 = vld [vmem:[%s3734_s2 + $0x1b0] sm:$0xff]  ;;  %v229_v19 = vld [vmem:[%s3734_s2 + $0x1a8] sm:$0xff] }
 0x156   : > { %2433 = vst [vmem:[%s3224_s8 + $0x368] sm:$0xff] %v1845_v39  ;;  %2435 = vst [vmem:[%s3224_s8 + $0x378] sm:$0xff] %v1898_v40  ;;  %v231_v40 = vld [vmem:[%s3734_s2 + $0x1b8] sm:$0xff] }
 0x160   : > { %v1934_v0 = vpop.f32.mrb[32].mxu0  ;;  %v1987_v54 = vpop.f32.mrb[32].mxu1 }
 0x161   : > { %v1935_v43 = vadd.f32 %v1934_v0, %v192_v24  ;;  %v1936_v60 = vpop.f32.mrb[33].mxu0  ;;  %v1988_v45 = vadd.f32 %v1987_v54, %v194_v22  ;;  %v1989_v47 = vpop.f32.mrb[33].mxu1 }
 0x162   : > { %v1937_v46 = vadd.f32 %v1936_v60, %v193_v27  ;;  %v1938_v55 = vpop.f32.mrb[34].mxu0  ;;  %v1990_v49 = vadd.f32 %v1989_v47, %v195_v28  ;;  %v1991_v50 = vpop.f32.mrb[34].mxu1  ;;  %v260_v60 = vld [vmem:[%s3734_s2 + $0x2a0] sm:$0xff] }
 0x163   : > { %2340 = vst [vmem:[%s3224_s8 + $0x80] sm:$0xff] %v1935_v43  ;;  %v1939_v25 = vadd.f32 %v1938_v55, %v224_v41  ;;  %v1940_v30 = vpop.f32.mrb[35].mxu0  ;;  %2342 = vst [vmem:[%s3224_s8 + $0x90] sm:$0xff] %v1988_v45  ;;  %v1992_v56 = vadd.f32 %v1991_v50, %v226_v44  ;;  %v1993_v57 = vpop.f32.mrb[35].mxu1  ;;  %v262_v44 = vld [vmem:[%s3734_s2 + $0x2b0] sm:$0xff]  ;;  %v292_v47 = vld [vmem:[%s3734_s2 + $0x3a0] sm:$0xff] }
 0x164   : > { %2341 = vst [vmem:[%s3224_s8 + $0x88] sm:$0xff] %v1937_v46  ;;  %v1941_v42 = vadd.f32 %v1940_v30, %v225_v58  ;;  %2343 = vst [vmem:[%s3224_s8 + $0x98] sm:$0xff] %v1990_v49  ;;  %v1994_v26 = vadd.f32 %v1993_v57, %v227_v59  ;;  %v261_v58 = vld [vmem:[%s3734_s2 + $0x2a8] sm:$0xff]  ;;  %v263_v46 = vld [vmem:[%s3734_s2 + $0x2b8] sm:$0xff] }
 0x165   : > { %2372 = vst [vmem:[%s3224_s8 + $0x180] sm:$0xff] %v1939_v25  ;;  %2374 = vst [vmem:[%s3224_s8 + $0x190] sm:$0xff] %v1992_v56  ;;  %v294_v25 = vld [vmem:[%s3734_s2 + $0x3b0] sm:$0xff]  ;;  %v293_v50 = vld [vmem:[%s3734_s2 + $0x3a8] sm:$0xff] }
 0x166   : > { %2373 = vst [vmem:[%s3224_s8 + $0x188] sm:$0xff] %v1941_v42  ;;  %2375 = vst [vmem:[%s3224_s8 + $0x198] sm:$0xff] %v1994_v26  ;;  %v295_v26 = vld [vmem:[%s3734_s2 + $0x3b8] sm:$0xff] }
 0x168   : > { %v1944_v63 = vpop.f32.mrb[36].mxu0  ;;  %v1997_v4 = vpop.f32.mrb[36].mxu1 }
 0x169   : > { %v1945_v3 = vadd.f32 %v1944_v63, %v256_v31  ;;  %v1946_v5 = vpop.f32.mrb[37].mxu0  ;;  %v1998_v7 = vadd.f32 %v1997_v4, %v258_v61  ;;  %v1999_v52 = vpop.f32.mrb[37].mxu1 }
 0x16a   : > { %v1947_v8 = vadd.f32 %v1946_v5, %v257_v62  ;;  %v1948_v9 = vpop.f32.mrb[38].mxu0  ;;  %v2000_v10 = vadd.f32 %v1999_v52, %v259_v1  ;;  %v2001_v11 = vpop.f32.mrb[38].mxu1  ;;  %v200_v5 = vld [vmem:[%s3734_s2 + $0xc0] sm:$0xff] }
 0x16b   : > { %2404 = vst [vmem:[%s3224_s8 + $0x280] sm:$0xff] %v1945_v3  ;;  %v1949_v53 = vadd.f32 %v1948_v9, %v288_v2  ;;  %v1950_v12 = vpop.f32.mrb[39].mxu0  ;;  %2406 = vst [vmem:[%s3224_s8 + $0x290] sm:$0xff] %v1998_v7  ;;  %v2002_v13 = vadd.f32 %v2001_v11, %v290_v6  ;;  %v2003_v15 = vpop.f32.mrb[39].mxu1  ;;  %v202_v6 = vld [vmem:[%s3734_s2 + $0xd0] sm:$0xff]  ;;  %v232_v52 = vld [vmem:[%s3734_s2 + $0x1c0] sm:$0xff] }
 0x16c   : > { %2405 = vst [vmem:[%s3224_s8 + $0x288] sm:$0xff] %v1947_v8  ;;  %v1951_v14 = vadd.f32 %v1950_v12, %v289_v51  ;;  %2407 = vst [vmem:[%s3224_s8 + $0x298] sm:$0xff] %v2000_v10  ;;  %v2004_v16 = vadd.f32 %v2003_v15, %v291_v48  ;;  %v201_v51 = vld [vmem:[%s3734_s2 + $0xc8] sm:$0xff]  ;;  %v203_v8 = vld [vmem:[%s3734_s2 + $0xd8] sm:$0xff] }
 0x16d   : > { %2436 = vst [vmem:[%s3224_s8 + $0x380] sm:$0xff] %v1949_v53  ;;  %2438 = vst [vmem:[%s3224_s8 + $0x390] sm:$0xff] %v2002_v13  ;;  %v234_v53 = vld [vmem:[%s3734_s2 + $0x1d0] sm:$0xff]  ;;  %v233_v11 = vld [vmem:[%s3734_s2 + $0x1c8] sm:$0xff] }
 0x16e   : > { %2437 = vst [vmem:[%s3224_s8 + $0x388] sm:$0xff] %v1951_v14  ;;  %2439 = vst [vmem:[%s3224_s8 + $0x398] sm:$0xff] %v2004_v16  ;;  %v235_v16 = vld [vmem:[%s3734_s2 + $0x1d8] sm:$0xff] }
 0x178   : > { %v2040_v33 = vpop.f32.mrb[40].mxu0  ;;  %v2093_v35 = vpop.f32.mrb[40].mxu1 }
 0x179   : > { %v2041_v18 = vadd.f32 %v2040_v33, %v196_v23  ;;  %v2042_v36 = vpop.f32.mrb[41].mxu0  ;;  %v2094_v21 = vadd.f32 %v2093_v35, %v198_v29  ;;  %v2095_v39 = vpop.f32.mrb[41].mxu1 }
 0x17a   : > { %v2043_v38 = vadd.f32 %v2042_v36, %v197_v32  ;;  %v2044_v20 = vpop.f32.mrb[42].mxu0  ;;  %v2096_v24 = vadd.f32 %v2095_v39, %v199_v17  ;;  %v2097_v27 = vpop.f32.mrb[42].mxu1  ;;  %v264_v36 = vld [vmem:[%s3734_s2 + $0x2c0] sm:$0xff] }
 0x17b   : > { %2344 = vst [vmem:[%s3224_s8 + $0xa0] sm:$0xff] %v2041_v18  ;;  %v2045_v22 = vadd.f32 %v2044_v20, %v228_v34  ;;  %v2046_v0 = vpop.f32.mrb[43].mxu0  ;;  %2346 = vst [vmem:[%s3224_s8 + $0xb0] sm:$0xff] %v2094_v21  ;;  %v2098_v28 = vadd.f32 %v2097_v27, %v230_v37  ;;  %v2099_v43 = vpop.f32.mrb[43].mxu1  ;;  %v266_v37 = vld [vmem:[%s3734_s2 + $0x2d0] sm:$0xff]  ;;  %v296_v39 = vld [vmem:[%s3734_s2 + $0x3c0] sm:$0xff] }
 0x17c   : > { %2345 = vst [vmem:[%s3224_s8 + $0xa8] sm:$0xff] %v2043_v38  ;;  %v2047_v41 = vadd.f32 %v2046_v0, %v229_v19  ;;  %2347 = vst [vmem:[%s3224_s8 + $0xb8] sm:$0xff] %v2096_v24  ;;  %v2100_v54 = vadd.f32 %v2099_v43, %v231_v40  ;;  %v265_v19 = vld [vmem:[%s3734_s2 + $0x2c8] sm:$0xff]  ;;  %v267_v38 = vld [vmem:[%s3734_s2 + $0x2d8] sm:$0xff] }
 0x17d   : > { %2376 = vst [vmem:[%s3224_s8 + $0x1a0] sm:$0xff] %v2045_v22  ;;  %2378 = vst [vmem:[%s3224_s8 + $0x1b0] sm:$0xff] %v2098_v28  ;;  %v298_v22 = vld [vmem:[%s3734_s2 + $0x3d0] sm:$0xff]  ;;  %v297_v27 = vld [vmem:[%s3734_s2 + $0x3c8] sm:$0xff] }
 0x17e   : > { %2377 = vst [vmem:[%s3224_s8 + $0x1a8] sm:$0xff] %v2047_v41  ;;  %2379 = vst [vmem:[%s3224_s8 + $0x1b8] sm:$0xff] %v2100_v54  ;;  %v299_v54 = vld [vmem:[%s3734_s2 + $0x3d8] sm:$0xff] }
 0x180   : > { %v2050_v45 = vpop.f32.mrb[44].mxu0  ;;  %v2103_v59 = vpop.f32.mrb[44].mxu1 }
 0x181   : > { %v2051_v55 = vadd.f32 %v2050_v45, %v260_v60  ;;  %v2052_v49 = vpop.f32.mrb[45].mxu0  ;;  %v2104_v30 = vadd.f32 %v2103_v59, %v262_v44  ;;  %v2105_v42 = vpop.f32.mrb[45].mxu1 }
 0x182   : > { %v2053_v56 = vadd.f32 %v2052_v49, %v261_v58  ;;  %v2054_v57 = vpop.f32.mrb[46].mxu0  ;;  %v2106_v31 = vadd.f32 %v2105_v42, %v263_v46  ;;  %v2107_v62 = vpop.f32.mrb[46].mxu1  ;;  %v204_v49 = vld [vmem:[%s3734_s2 + $0xe0] sm:$0xff] }
 0x183   : > { %2408 = vst [vmem:[%s3224_s8 + $0x2a0] sm:$0xff] %v2051_v55  ;;  %v2055_v61 = vadd.f32 %v2054_v57, %v292_v47  ;;  %v2056_v63 = vpop.f32.mrb[47].mxu0  ;;  %2410 = vst [vmem:[%s3224_s8 + $0x2b0] sm:$0xff] %v2104_v30  ;;  %v2108_v1 = vadd.f32 %v2107_v62, %v294_v25  ;;  %v2109_v3 = vpop.f32.mrb[47].mxu1  ;;  %v206_v25 = vld [vmem:[%s3734_s2 + $0xf0] sm:$0xff]  ;;  %v236_v42 = vld [vmem:[%s3734_s2 + $0x1e0] sm:$0xff] }
 0x184   : > { %2409 = vst [vmem:[%s3224_s8 + $0x2a8] sm:$0xff] %v2053_v56  ;;  %v2057_v2 = vadd.f32 %v2056_v63, %v293_v50  ;;  %2411 = vst [vmem:[%s3224_s8 + $0x2b8] sm:$0xff] %v2106_v31  ;;  %v2110_v4 = vadd.f32 %v2109_v3, %v295_v26  ;;  %v205_v50 = vld [vmem:[%s3734_s2 + $0xe8] sm:$0xff]  ;;  %v207_v56 = vld [vmem:[%s3734_s2 + $0xf8] sm:$0xff] }
 0x185   : > { %2440 = vst [vmem:[%s3224_s8 + $0x3a0] sm:$0xff] %v2055_v61  ;;  %2442 = vst [vmem:[%s3224_s8 + $0x3b0] sm:$0xff] %v2108_v1  ;;  %v238_v61 = vld [vmem:[%s3734_s2 + $0x1f0] sm:$0xff]  ;;  %v237_v62 = vld [vmem:[%s3734_s2 + $0x1e8] sm:$0xff] }
 0x186   : > { %2441 = vst [vmem:[%s3224_s8 + $0x3a8] sm:$0xff] %v2057_v2  ;;  %2443 = vst [vmem:[%s3224_s8 + $0x3b8] sm:$0xff] %v2110_v4  ;;  %v239_v4 = vld [vmem:[%s3734_s2 + $0x1f8] sm:$0xff] }
 0x190   : > { %v2146_v7 = vpop.f32.mrb[48].mxu0  ;;  %v2199_v48 = vpop.f32.mrb[48].mxu1 }
 0x191   : > { %v2147_v9 = vadd.f32 %v2146_v7, %v200_v5  ;;  %v2148_v10 = vpop.f32.mrb[49].mxu0  ;;  %v2200_v12 = vadd.f32 %v2199_v48, %v202_v6  ;;  %v2201_v14 = vpop.f32.mrb[49].mxu1 }
 0x192   : > { %v2149_v13 = vadd.f32 %v2148_v10, %v201_v51  ;;  %v2150_v15 = vpop.f32.mrb[50].mxu0  ;;  %v2202_v23 = vadd.f32 %v2201_v14, %v203_v8  ;;  %v2203_v32 = vpop.f32.mrb[50].mxu1  ;;  %v268_v10 = vld [vmem:[%s3734_s2 + $0x2e0] sm:$0xff] }
 0x193   : > { %2348 = vst [vmem:[%s3224_s8 + $0xc0] sm:$0xff] %v2147_v9  ;;  %v2151_v29 = vadd.f32 %v2150_v15, %v232_v52  ;;  %v2152_v33 = vpop.f32.mrb[51].mxu0  ;;  %2350 = vst [vmem:[%s3224_s8 + $0xd0] sm:$0xff] %v2200_v12  ;;  %v2204_v17 = vadd.f32 %v2203_v32, %v234_v53  ;;  %v2205_v18 = vpop.f32.mrb[51].mxu1  ;;  %v270_v53 = vld [vmem:[%s3734_s2 + $0x2f0] sm:$0xff]  ;;  %v300_v14 = vld [vmem:[%s3734_s2 + $0x3e0] sm:$0xff] }
 0x194   : > { %2349 = vst [vmem:[%s3224_s8 + $0xc8] sm:$0xff] %v2149_v13  ;;  %v2153_v34 = vadd.f32 %v2152_v33, %v233_v11  ;;  %2351 = vst [vmem:[%s3224_s8 + $0xd8] sm:$0xff] %v2202_v23  ;;  %v2206_v35 = vadd.f32 %v2205_v18, %v235_v16  ;;  %v269_v11 = vld [vmem:[%s3734_s2 + $0x2e8] sm:$0xff]  ;;  %v271_v13 = vld [vmem:[%s3734_s2 + $0x2f8] sm:$0xff] }
 0x195   : > { %2380 = vst [vmem:[%s3224_s8 + $0x1c0] sm:$0xff] %v2151_v29  ;;  %2382 = vst [vmem:[%s3224_s8 + $0x1d0] sm:$0xff] %v2204_v17  ;;  %v302_v29 = vld [vmem:[%s3734_s2 + $0x3f0] sm:$0xff]  ;;  %v301_v32 = vld [vmem:[%s3734_s2 + $0x3e8] sm:$0xff] }
 0x196   : > { %2381 = vst [vmem:[%s3224_s8 + $0x1c8] sm:$0xff] %v2153_v34  ;;  %2383 = vst [vmem:[%s3224_s8 + $0x1d8] sm:$0xff] %v2206_v35  ;;  %v303_v35 = vld [vmem:[%s3734_s2 + $0x3f8] sm:$0xff] }
 0x198   : > { %v2156_v21 = vpop.f32.mrb[52].mxu0  ;;  %v2209_v40 = vpop.f32.mrb[52].mxu1 }
 0x199   : > { %v2157_v20 = vadd.f32 %v2156_v21, %v264_v36  ;;  %v2158_v24 = vpop.f32.mrb[53].mxu0  ;;  %v2210_v0 = vadd.f32 %v2209_v40, %v266_v37  ;;  %v2211_v41 = vpop.f32.mrb[53].mxu1 }
 0x19a   : > { %v2159_v28 = vadd.f32 %v2158_v24, %v265_v19  ;;  %v2160_v43 = vpop.f32.mrb[54].mxu0  ;;  %v2212_v60 = vadd.f32 %v2211_v41, %v267_v38  ;;  %v2213_v58 = vpop.f32.mrb[54].mxu1 }
 0x19b   : > { %2412 = vst [vmem:[%s3224_s8 + $0x2c0] sm:$0xff] %v2157_v20  ;;  %v2161_v44 = vadd.f32 %v2160_v43, %v296_v39  ;;  %v2162_v45 = vpop.f32.mrb[55].mxu0  ;;  %2414 = vst [vmem:[%s3224_s8 + $0x2d0] sm:$0xff] %v2210_v0  ;;  %v2214_v46 = vadd.f32 %v2213_v58, %v298_v22  ;;  %v2215_v55 = vpop.f32.mrb[55].mxu1 }
 0x19c   : > { %2413 = vst [vmem:[%s3224_s8 + $0x2c8] sm:$0xff] %v2159_v28  ;;  %v2163_v47 = vadd.f32 %v2162_v45, %v297_v27  ;;  %2415 = vst [vmem:[%s3224_s8 + $0x2d8] sm:$0xff] %v2212_v60  ;;  %v2216_v59 = vadd.f32 %v2215_v55, %v299_v54 }
 0x19d   : > { %2444 = vst [vmem:[%s3224_s8 + $0x3c0] sm:$0xff] %v2161_v44  ;;  %2446 = vst [vmem:[%s3224_s8 + $0x3d0] sm:$0xff] %v2214_v46 }
 0x19e   : > { %2445 = vst [vmem:[%s3224_s8 + $0x3c8] sm:$0xff] %v2163_v47  ;;  %2447 = vst [vmem:[%s3224_s8 + $0x3d8] sm:$0xff] %v2216_v59 }
 0x1a8   : > { %v2252_v30 = vpop.f32.mrb[56].mxu0  ;;  %v2305_v26 = vpop.f32.mrb[56].mxu1 }
 0x1a9   : > { %v2253_v57 = vadd.f32 %v2252_v30, %v204_v49  ;;  %v2254_v31 = vpop.f32.mrb[57].mxu0  ;;  %v2306_v63 = vadd.f32 %v2305_v26, %v206_v25  ;;  %v2307_v2 = vpop.f32.mrb[57].mxu1 }
 0x1aa   : > { %v2255_v1 = vadd.f32 %v2254_v31, %v205_v50  ;;  %v2256_v3 = vpop.f32.mrb[58].mxu0  ;;  %v2308_v5 = vadd.f32 %v2307_v2, %v207_v56  ;;  %v2309_v51 = vpop.f32.mrb[58].mxu1 }
 0x1ab   : > { %2352 = vst [vmem:[%s3224_s8 + $0xe0] sm:$0xff] %v2253_v57  ;;  %v2257_v6 = vadd.f32 %v2256_v3, %v236_v42  ;;  %v2258_v7 = vpop.f32.mrb[59].mxu0  ;;  %2354 = vst [vmem:[%s3224_s8 + $0xf0] sm:$0xff] %v2306_v63  ;;  %v2310_v8 = vadd.f32 %v2309_v51, %v238_v61  ;;  %v2311_v9 = vpop.f32.mrb[59].mxu1 }
 0x1ac   : > { %2353 = vst [vmem:[%s3224_s8 + $0xe8] sm:$0xff] %v2255_v1  ;;  %v2259_v52 = vadd.f32 %v2258_v7, %v237_v62  ;;  %2355 = vst [vmem:[%s3224_s8 + $0xf8] sm:$0xff] %v2308_v5  ;;  %v2312_v48 = vadd.f32 %v2311_v9, %v239_v4 }
 0x1ad   : > { %2384 = vst [vmem:[%s3224_s8 + $0x1e0] sm:$0xff] %v2257_v6  ;;  %2386 = vst [vmem:[%s3224_s8 + $0x1f0] sm:$0xff] %v2310_v8 }
 0x1ae   : > { %2385 = vst [vmem:[%s3224_s8 + $0x1e8] sm:$0xff] %v2259_v52  ;;  %2387 = vst [vmem:[%s3224_s8 + $0x1f8] sm:$0xff] %v2312_v48 }
 0x1b0   : > { %v2262_v12 = vpop.f32.mrb[60].mxu0  ;;  %v2315_v16 = vpop.f32.mrb[60].mxu1 }
 0x1b1   : > { %v2263_v15 = vadd.f32 %v2262_v12, %v268_v10  ;;  %v2264_v23 = vpop.f32.mrb[61].mxu0  ;;  %v2316_v33 = vadd.f32 %v2315_v16, %v270_v53  ;;  %v2317_v34 = vpop.f32.mrb[61].mxu1 }
 0x1b2   : > { %v2265_v17 = vadd.f32 %v2264_v23, %v269_v11  ;;  %v2266_v18 = vpop.f32.mrb[62].mxu0  ;;  %v2318_v36 = vadd.f32 %v2317_v34, %v271_v13  ;;  %v2319_v19 = vpop.f32.mrb[62].mxu1 }
 0x1b3   : > { %2416 = vst [vmem:[%s3224_s8 + $0x2e0] sm:$0xff] %v2263_v15  ;;  %v2267_v37 = vadd.f32 %v2266_v18, %v300_v14  ;;  %v2268_v21 = vpop.f32.mrb[63].mxu0  ;;  %2418 = vst [vmem:[%s3224_s8 + $0x2f0] sm:$0xff] %v2316_v33  ;;  %v2320_v38 = vadd.f32 %v2319_v19, %v302_v29  ;;  %v2321_v20 = vpop.f32.mrb[63].mxu1 }
 0x1b4   : > { %2417 = vst [vmem:[%s3224_s8 + $0x2e8] sm:$0xff] %v2265_v17  ;;  %v2269_v39 = vadd.f32 %v2268_v21, %v301_v32  ;;  %2419 = vst [vmem:[%s3224_s8 + $0x2f8] sm:$0xff] %v2318_v36  ;;  %v2322_v40 = vadd.f32 %v2321_v20, %v303_v35 }
 0x1b5   : > { %2448 = vst [vmem:[%s3224_s8 + $0x3e0] sm:$0xff] %v2267_v37  ;;  %2450 = vst [vmem:[%s3224_s8 + $0x3f0] sm:$0xff] %v2320_v38 }
 0x1b6   : > { %2449 = vst [vmem:[%s3224_s8 + $0x3e8] sm:$0xff] %v2269_v39  ;;  %2451 = vst [vmem:[%s3224_s8 + $0x3f8] sm:$0xff] %v2322_v40 }
 0x1b7 PF: > { %s13_s12 = sadd.s32 1, %s2796_s12  }
 0x1b8   : > { %p10_p4 = scmp.ge.s32.totalorder %s13_s12, 4  }
 0x1ba   :  { %12 = sbr.rel (!%p10_p4) target bundleno = 1 (0x1), region = 62 }

</bundles_post_ra>
